<compile_context>
chip_gen: v7x
topology: tpu7x:2x2x1
jax: 0.10.0
libtpu: 0.0.40
codegen_flags: <defaults>
</compile_context>

<pallas_src>
import jax
import jax.numpy as jnp
from jax.experimental import pallas as pl
from jax.experimental.pallas import tpu as pltpu


def _conv1x1_kernel(w_ref, x_ref, o_ref):
    # w_ref: (Ct, Cin)  bf16 weight tile (pre-cast outside the hot path)
    # x_ref: (Cin, HW)  one image, NCHW layout flattened (no transpose needed)
    # o_ref: (Ct, HW)   output tile
    o_ref[...] = jnp.dot(
        w_ref[...],
        x_ref[...].astype(jnp.bfloat16),
        preferred_element_type=jnp.float32,
    ).astype(o_ref.dtype)


def _num_tensorcores() -> int:
    """2 TensorCores per chip on v7x, 1 on v5e/v6e.  Safe fallback = 1."""
    try:
        kind = jax.devices()[0].device_kind.lower()
        if "v7" in kind:
            return 2
    except Exception:
        pass
    return 1


def prepare_weight(weight_oihw: jax.Array) -> jax.Array:
    """One-time (amortized) prep: OIHW 1x1 weight -> bf16 (Cout, Cin) matrix."""
    cout, cin = weight_oihw.shape[0], weight_oihw.shape[1]
    return weight_oihw.reshape(cout, cin).astype(jnp.bfloat16)


def conv2d_1x1(x_nchw: jax.Array, w_mat_bf16: jax.Array, *, block_cout: int | None = None):
    """1x1 stride-1 conv, no bias.  x: [N, Cin, H, W], w_mat_bf16: [Cout, Cin] bf16."""
    n, cin, h, w = x_nchw.shape
    cout = w_mat_bf16.shape[0]
    hw = h * w

    # Free reshape only (layout-preserving, no HBM round-trip transpose).
    x_3d = x_nchw.reshape(n, cin, hw)

    # One Cout tile per TensorCore: grid is (1, n) on v5e/v6e, (2, n) on v7x.
    if block_cout is None:
        ntc = _num_tensorcores()
        block_cout = cout // ntc if (ntc > 1 and cout % ntc == 0) else cout
    ct = block_cout if (cout % block_cout == 0 and block_cout % 8 == 0) else cout

    x_item = jnp.dtype(x_nchw.dtype).itemsize
    w_item = jnp.dtype(w_mat_bf16.dtype).itemsize
    cost = pl.CostEstimate(
        flops=2 * n * hw * cin * cout,
        transcendentals=0,
        bytes_accessed=(n * cin * hw * x_item
                        + cout * cin * w_item
                        + n * cout * hw * x_item),
    )

    out_3d = pl.pallas_call(
        _conv1x1_kernel,
        out_shape=jax.ShapeDtypeStruct((n, cout, hw), x_nchw.dtype),
        grid_spec=pltpu.PrefetchScalarGridSpec(
            num_scalar_prefetch=0,
            # Cout tiles OUTERMOST: each weight tile is DMA'd exactly once per
            # kernel call, regardless of batch size.
            grid=(cout // ct, n),
            in_specs=[
                # Weight tile walks Cout only (Ct multiple of 8, Cin=256 lane-aligned).
                pl.BlockSpec((ct, cin), lambda j, b: (j, 0)),
                # Full image per batch index (HW=196 equals full array dim).
                pl.BlockSpec((None, cin, hw), lambda j, b: (b, 0, 0)),
            ],
            out_specs=pl.BlockSpec((None, ct, hw), lambda j, b: (b, j, 0)),
        ),
        compiler_params=pltpu.CompilerParams(
            dimension_semantics=("parallel", "parallel"),
        ),
        cost_estimate=cost,
    )(w_mat_bf16, x_3d)

    # (N, Cout, H*W) -> NCHW [N, Cout, H, W]  (free reshape, same layout)
    return out_3d.reshape(n, cout, h, w)


if __name__ == "__main__":
    key = jax.random.PRNGKey(0)
    kx, kw = jax.random.split(key)

    # Shapes from the module: x416 = [1, 256, 14, 14], weight = [1024, 256, 1, 1]
    x = jax.random.normal(kx, (1, 256, 14, 14), dtype=jnp.float32)
    fan_in = 256
    bound = 1.0 / (fan_in ** 0.5)
    weight = jax.random.uniform(
        kw, (1024, 256, 1, 1), dtype=jnp.float32, minval=-bound, maxval=bound
    )

    # One-time weight prep (amortized across calls in a real model).
    w_mat = jax.block_until_ready(prepare_weight(weight))

    out = conv2d_1x1(x, w_mat)
    out = jax.block_until_ready(out)
    assert out.shape == (1, 1024, 14, 14), out.shape

    # Reference 1: full-f32 XLA conv, loose tolerance (kernel uses bf16 operands).
    ref_f32 = jax.lax.conv_general_dilated(
        x, weight, window_strides=(1, 1), padding="VALID",
        dimension_numbers=("NCHW", "OIHW", "NCHW"),
    )
    assert jnp.allclose(out, ref_f32, atol=2e-2, rtol=2e-2)

    # Reference 2: bf16-input conv with f32 accumulation, tight tolerance
    # (apples-to-apples check of the kernel's actual numerics).
    ref_bf16 = jax.lax.conv_general_dilated(
        x.astype(jnp.bfloat16), weight.astype(jnp.bfloat16),
        window_strides=(1, 1), padding="VALID",
        dimension_numbers=("NCHW", "OIHW", "NCHW"),
        preferred_element_type=jnp.float32,
    )
    assert jnp.allclose(out, ref_bf16, atol=1e-3, rtol=1e-3)

    print("KERNEL_OK")
</pallas_src>

<mosaic_0001>
module attributes {stable_mosaic.version = 11 : i64} {
  func.func @_conv1x1_kernel(%arg0: i32, %arg1: i32, %arg2: memref<1024x256xbf16, #tpu.memory_space<vmem>>, %arg3: memref<1x256x196xf32, #tpu.memory_space<vmem>>, %arg4: memref<1x1024x196xf32, #tpu.memory_space<vmem>>) attributes {dimension_semantics = [#tpu.dimension_semantics<parallel>, #tpu.dimension_semantics<parallel>], iteration_bounds = array<i64: 1, 1>, scalar_prefetch = 0 : i64, scratch_operands = 0 : i64, tpu.core_type = #tpu.core_type<tc>, window_params = [{transform_indices = @transform_0, window_bounds = array<i64: 1024, 256>}, {transform_indices = @transform_1, window_bounds = array<i64: 1, 256, 196>}, {transform_indices = @transform_2, window_bounds = array<i64: 1, 1024, 196>}]} {
    %c0 = arith.constant 0 : index
    %c0_0 = arith.constant 0 : index
    %0 = vector.load %arg2[%c0, %c0_0] : memref<1024x256xbf16, #tpu.memory_space<vmem>>, vector<1024x256xbf16>
    %c0_1 = arith.constant 0 : index
    %c0_2 = arith.constant 0 : index
    %c0_3 = arith.constant 0 : index
    %1 = vector.load %arg3[%c0_1, %c0_2, %c0_3] : memref<1x256x196xf32, #tpu.memory_space<vmem>>, vector<1x256x196xf32>
    %2 = vector.shape_cast %1 : vector<1x256x196xf32> to vector<256x196xf32>
    %3 = arith.truncf %2 : vector<256x196xf32> to vector<256x196xbf16>
    %cst = arith.constant dense<0.000000e+00> : vector<1024x196xf32>
    %4 = tpu.matmul %0, %3, %cst {dimension_numbers = #tpu.dot_dimension_numbers<[1], [0], [0], [1], [0, 0, 1, 1], [], []>} : vector<1024x256xbf16>, vector<256x196xbf16>, vector<1024x196xf32> -> vector<1024x196xf32>
    %c0_4 = arith.constant 0 : index
    %c0_5 = arith.constant 0 : index
    %c0_6 = arith.constant 0 : index
    %5 = vector.load %arg4[%c0_4, %c0_5, %c0_6] : memref<1x1024x196xf32, #tpu.memory_space<vmem>>, vector<1x1024x196xf32>
    %6 = vector.shape_cast %5 : vector<1x1024x196xf32> to vector<1024x196xf32>
    %7 = vector.shape_cast %4 : vector<1024x196xf32> to vector<1x1024x196xf32>
    tpu.vector_store %arg4[%c0_4, %c0_5, %c0_6], %7 {strides = array<i32>} : memref<1x1024x196xf32, #tpu.memory_space<vmem>>, vector<1x1024x196xf32>,
    return
  }
  func.func @transform_0(%arg0: i32, %arg1: i32) -> (i32, i32) {
    %c0_i32 = arith.constant 0 : i32
    %c0_i32_0 = arith.constant 0 : i32
    return %arg0, %c0_i32 : i32, i32
  }
  func.func @transform_1(%arg0: i32, %arg1: i32) -> (i32, i32, i32) {
    %c0_i32 = arith.constant 0 : i32
    %c0_i32_0 = arith.constant 0 : i32
    %c0_i32_1 = arith.constant 0 : i32
    return %arg1, %c0_i32, %c0_i32_0 : i32, i32, i32
  }
  func.func @transform_2(%arg0: i32, %arg1: i32) -> (i32, i32, i32) {
    %c0_i32 = arith.constant 0 : i32
    %c0_i32_0 = arith.constant 0 : i32
    return %arg1, %arg0, %c0_i32 : i32, i32, i32
  }
}

</mosaic_0001>

<bundles_post_ra>
// kernel: tpu_custom_call.1
= control target key start
LH: loop header
LB: loop body
LE: loop exit
PB: predicated region body
PF: predicated region fallthrough
CT: control target
= control target key end

     0   :  { %7 = vsyncpa [#allocation3], 0  ;;  %s2203_s9 = smov [#allocation2]   ;;  %s3321_s0 = inlined_call_operand.hbm [shape: bf16[1024,256], index: 0, kind: input, shape index: {}]   ;;  %s3322_s1 = inlined_call_operand.vmem [shape: f32[1,256,196], index: 1, kind: input, shape index: {}]   ;;  %s3323_s2 = inlined_call_operand.vmem [shape: f32[1,1024,196], index: 2, kind: output, shape index: {}]  }
   0x1   :  { %s13_s10 = sshll.u32 %s2203_s9, 4  ;;  %s2179_s13 = scalar_lea.hbm %s3321_s0, 16384  ;;  %s14_s10 = int_to_ptr.vmem [resolvable:$true] %s13_s10 }
   0x2   :  { %p2180_p0 = scmp.ne.s32.totalorder %s3321_s0, %s2179_s13  ;;  %p2183_p1 = scmp.lt.u32.totalorder %s2179_s13, %s3321_s0 }
   0x4   :  { %p2185_p2 = pnand %p2183_p1, %p2180_p0 }
   0x6   :  { %2188 = shalt.err (!%p2185_p2)
}
   0x7   :  { %s2189_s18 = scalar_lea.vmem %s14_s10, 16384  ;;  %p2194_p4 = scmp.lt.s32.totalorder %s14_s10, %s14_s10 }
   0x8   :  { %p2190_p3 = scmp.ne.s32.totalorder %s14_s10, %s2189_s18  ;;  %p2195_p5 = scmp.lt.s32.totalorder %s2189_s18, %s2189_s18 }
   0xa   :  { %p2196_p6 = por %p2195_p5, %p2194_p4 }
   0xc   :  { %p2197_p7 = pnand %p2196_p6, %p2190_p3 }
   0xe   :  { %2200 = shalt.err (!%p2197_p7)
}
   0xf   :  { %s2204_s19 = smov 128   ;;  %s2205_s20 = smov 8  }
  0x10   :  { %19 = dma.hbm_to_vmem [thread:$0]  %s3321_s0, 16384, %s14_s10, [#allocation3], %s2204_s19, %s2204_s19, %s2205_s20  }
  0x11   :  { %2201 = dma.done.wait [#allocation3], 16384  }
  0x12   :  { %2202 = vsyncadd [#allocation3], 4294950912  ;;  %v154_v0 = vld [vmem:[%s3322_s1 + $0x8] sm:$0xff]  ;;  %v156_v1 = vld [vmem:[%s3322_s1 + $0x18] sm:$0xff]  ;;  %vm1563_vm0 = vcmask 556032  }
  0x13   :  { %v153_v2 = vld [vmem:[%s3322_s1] sm:$0xff]  ;;  %v218_v3 = vpack.c.bf16 %v156_v1, %v154_v0  ;;  %v155_v4 = vld [vmem:[%s3322_s1 + $0x10] sm:$0xff]  ;;  %v158_v5 = vld [vmem:[%s3322_s1 + $0x28] sm:$0xff] }
  0x14   :  { %v160_v6 = vld [vmem:[%s3322_s1 + $0x38] sm:$0xff]  ;;  %v217_v7 = vpack.c.bf16 %v155_v4, %v153_v2  ;;  %v157_v9 = vld [vmem:[%s3322_s1 + $0x20] sm:$0xff]  ;;  %v159_v10 = vld [vmem:[%s3322_s1 + $0x30] sm:$0xff] }
  0x15   :  { %v220_v8 = vpack.c.bf16 %v160_v6, %v158_v5  ;;  %v162_v11 = vld [vmem:[%s3322_s1 + $0x48] sm:$0xff]  ;;  %889 = vmatprep.subr.bf16.mxu0 %v218_v3  ;;  %1952 = vmatprep.subr.bf16.mxu1 %v218_v3  ;;  %v164_v12 = vld [vmem:[%s3322_s1 + $0x58] sm:$0xff]  ;;  %v219_v13 = vpack.c.bf16 %v159_v10, %v157_v9  ;;  %v161_v15 = vld [vmem:[%s3322_s1 + $0x40] sm:$0xff] }
  0x16   :  { %890 = vmatpush1.bf16.msra.mxu0 %v217_v7  ;;  %1968 = vmatpush1.bf16.msra.mxu1 %v217_v7  ;;  %v222_v14 = vpack.c.bf16 %v164_v12, %v162_v11  ;;  %v163_v16 = vld [vmem:[%s3322_s1 + $0x50] sm:$0xff]  ;;  %v166_v17 = vld [vmem:[%s3322_s1 + $0x68] sm:$0xff]  ;;  %v168_v18 = vld [vmem:[%s3322_s1 + $0x78] sm:$0xff] }
  0x17   :  { %891 = vmatprep.subr.bf16.mxu0 %v220_v8  ;;  %1953 = vmatprep.subr.bf16.mxu1 %v220_v8  ;;  %v221_v19 = vpack.c.bf16 %v163_v16, %v161_v15  ;;  %v224_v20 = vpack.c.bf16 %v168_v18, %v166_v17  ;;  %v165_v21 = vld [vmem:[%s3322_s1 + $0x60] sm:$0xff]  ;;  %v167_v22 = vld [vmem:[%s3322_s1 + $0x70] sm:$0xff]  ;;  %v170_v23 = vld [vmem:[%s3322_s1 + $0x88] sm:$0xff] }
  0x18   :  { %v172_v24 = vld [vmem:[%s3322_s1 + $0x98] sm:$0xff]  ;;  %v223_v25 = vpack.c.bf16 %v167_v22, %v165_v21  ;;  %v169_v27 = vld [vmem:[%s3322_s1 + $0x80] sm:$0xff]  ;;  %v171_v28 = vld [vmem:[%s3322_s1 + $0x90] sm:$0xff] }
  0x19   :  { %v226_v26 = vpack.c.bf16 %v172_v24, %v170_v23  ;;  %v174_v29 = vld [vmem:[%s3322_s1 + $0xa8] sm:$0xff]  ;;  %v176_v30 = vld [vmem:[%s3322_s1 + $0xb8] sm:$0xff]  ;;  %v225_v31 = vpack.c.bf16 %v171_v28, %v169_v27  ;;  %v173_v33 = vld [vmem:[%s3322_s1 + $0xa0] sm:$0xff] }
  0x1a   :  { %892 = vmatpush1.bf16.msra.mxu0 %v219_v13  ;;  %1969 = vmatpush1.bf16.msra.mxu1 %v219_v13  ;;  %v228_v32 = vpack.c.bf16 %v176_v30, %v174_v29  ;;  %v175_v34 = vld [vmem:[%s3322_s1 + $0xb0] sm:$0xff]  ;;  %v178_v35 = vld [vmem:[%s3322_s1 + $0xc8] sm:$0xff]  ;;  %v180_v36 = vld [vmem:[%s3322_s1 + $0xd8] sm:$0xff] }
  0x1b   :  { %893 = vmatprep.subr.bf16.mxu0 %v222_v14  ;;  %1954 = vmatprep.subr.bf16.mxu1 %v222_v14  ;;  %v227_v37 = vpack.c.bf16 %v175_v34, %v173_v33  ;;  %v177_v38 = vld [vmem:[%s3322_s1 + $0xc0] sm:$0xff]  ;;  %v179_v39 = vld [vmem:[%s3322_s1 + $0xd0] sm:$0xff]  ;;  %v230_v40 = vpack.c.bf16 %v180_v36, %v178_v35  ;;  %v182_v41 = vld [vmem:[%s3322_s1 + $0xe8] sm:$0xff] }
  0x1c   :  { %v184_v42 = vld [vmem:[%s3322_s1 + $0xf8] sm:$0xff]  ;;  %v1989_v43 = vld [vmem:[#allocation2 + $0x4] ss:$8 sps:$4 sm:$0xff]   ;;  %v229_v45 = vpack.c.bf16 %v179_v39, %v177_v38  ;;  %v183_v48 = vld [vmem:[%s3322_s1 + $0xf0] sm:$0xff] }
  0x1d   :  { %v1992_v44 = vld [vmem:[#allocation2 + $0x204] ss:$8 sps:$4 sm:$0xff]   ;;  %v232_v47 = vpack.c.bf16 %v184_v42, %v182_v41  ;;  %v188_v50 = vld [vmem:[%s3322_s1 + $0x118] sm:$0xff]  ;;  %921 = vmatprep.mubr.bf16.mxu0 %v1989_v43  ;;  %v187_v53 = vld [vmem:[%s3322_s1 + $0x110] sm:$0xff] }
  0x1e   :  { %894 = vmatpush1.bf16.msra.mxu0 %v221_v19  ;;  %1970 = vmatpush1.bf16.msra.mxu1 %v221_v19  ;;  %v181_v46 = vld [vmem:[%s3322_s1 + $0xe0] sm:$0xff]  ;;  %v186_v49 = vld [vmem:[%s3322_s1 + $0x108] sm:$0xff]  ;;  %v192_v56 = vld [vmem:[%s3322_s1 + $0x138] sm:$0xff] }
  0x1f   :  { %895 = vmatprep.subr.bf16.mxu0 %v224_v20  ;;  %1955 = vmatprep.subr.bf16.mxu1 %v224_v20  ;;  %v231_v51 = vpack.c.bf16 %v183_v48, %v181_v46  ;;  %v185_v52 = vld [vmem:[%s3322_s1 + $0x100] sm:$0xff]  ;;  %v234_v54 = vpack.c.bf16 %v188_v50, %v186_v49  ;;  %v190_v55 = vld [vmem:[%s3322_s1 + $0x128] sm:$0xff]  ;;  %v191_v60 = vld [vmem:[%s3322_s1 + $0x130] sm:$0xff] }
  0x20   :  { %1241 = vmatprep.mubr.bf16.mxu1 %v1992_v44  ;;  %v233_v57 = vpack.c.bf16 %v187_v53, %v185_v52  ;;  %v189_v58 = vld [vmem:[%s3322_s1 + $0x120] sm:$0xff]  ;;  %v236_v59 = vpack.c.bf16 %v192_v56, %v190_v55  ;;  %v194_v61 = vld [vmem:[%s3322_s1 + $0x148] sm:$0xff]  ;;  %v196_v62 = vld [vmem:[%s3322_s1 + $0x158] sm:$0xff] }
  0x21   :  { %v235_v63 = vpack.c.bf16 %v191_v60, %v189_v58  ;;  %v193_v0 = vld [vmem:[%s3322_s1 + $0x140] sm:$0xff]  ;;  %v195_v1 = vld [vmem:[%s3322_s1 + $0x150] sm:$0xff]  ;;  %v238_v2 = vpack.c.bf16 %v196_v62, %v194_v61  ;;  %v198_v3 = vld [vmem:[%s3322_s1 + $0x168] sm:$0xff] }
  0x22   :  { %896 = vmatpush1.bf16.msra.mxu0 %v223_v25  ;;  %1971 = vmatpush1.bf16.msra.mxu1 %v223_v25  ;;  %v200_v4 = vld [vmem:[%s3322_s1 + $0x178] sm:$0xff]  ;;  %v237_v5 = vpack.c.bf16 %v195_v1, %v193_v0  ;;  %v197_v6 = vld [vmem:[%s3322_s1 + $0x160] sm:$0xff]  ;;  %v199_v8 = vld [vmem:[%s3322_s1 + $0x170] sm:$0xff] }
  0x23   :  { %897 = vmatprep.subr.bf16.mxu0 %v226_v26  ;;  %1956 = vmatprep.subr.bf16.mxu1 %v226_v26  ;;  %v240_v7 = vpack.c.bf16 %v200_v4, %v198_v3  ;;  %v202_v9 = vld [vmem:[%s3322_s1 + $0x188] sm:$0xff]  ;;  %v204_v10 = vld [vmem:[%s3322_s1 + $0x198] sm:$0xff]  ;;  %v239_v11 = vpack.c.bf16 %v199_v8, %v197_v6  ;;  %v201_v12 = vld [vmem:[%s3322_s1 + $0x180] sm:$0xff] }
  0x24   :  { %v203_v13 = vld [vmem:[%s3322_s1 + $0x190] sm:$0xff]  ;;  %v242_v14 = vpack.c.bf16 %v204_v10, %v202_v9  ;;  %v206_v15 = vld [vmem:[%s3322_s1 + $0x1a8] sm:$0xff]  ;;  %v208_v16 = vld [vmem:[%s3322_s1 + $0x1b8] sm:$0xff] }
  0x25   :  { %v241_v17 = vpack.c.bf16 %v203_v13, %v201_v12  ;;  %v205_v18 = vld [vmem:[%s3322_s1 + $0x1a0] sm:$0xff]  ;;  %v244_v19 = vpack.c.bf16 %v208_v16, %v206_v15  ;;  %v207_v20 = vld [vmem:[%s3322_s1 + $0x1b0] sm:$0xff]  ;;  %v210_v21 = vld [vmem:[%s3322_s1 + $0x1c8] sm:$0xff] }
  0x26   :  { %898 = vmatpush1.bf16.msra.mxu0 %v225_v31  ;;  %1972 = vmatpush1.bf16.msra.mxu1 %v225_v31  ;;  %v212_v22 = vld [vmem:[%s3322_s1 + $0x1d8] sm:$0xff]  ;;  %v243_v23 = vpack.c.bf16 %v207_v20, %v205_v18  ;;  %v209_v24 = vld [vmem:[%s3322_s1 + $0x1c0] sm:$0xff]  ;;  %v211_v25 = vld [vmem:[%s3322_s1 + $0x1d0] sm:$0xff] }
  0x27   :  { %899 = vmatprep.subr.bf16.mxu0 %v228_v32  ;;  %1957 = vmatprep.subr.bf16.mxu1 %v228_v32  ;;  %v246_v26 = vpack.c.bf16 %v212_v22, %v210_v21  ;;  %v214_v27 = vld [vmem:[%s3322_s1 + $0x1e8] sm:$0xff]  ;;  %v216_v28 = vld [vmem:[%s3322_s1 + $0x1f8] sm:$0xff]  ;;  %v245_v29 = vpack.c.bf16 %v211_v25, %v209_v24  ;;  %v213_v30 = vld [vmem:[%s3322_s1 + $0x1e0] sm:$0xff] }
  0x28   :  { %v248_v31 = vpack.c.bf16 %v216_v28, %v214_v27  ;;  %v215_v32 = vld [vmem:[%s3322_s1 + $0x1f0] sm:$0xff]  ;;  %v1987_v34 = vld [vmem:[#allocation2] ss:$8 sps:$4 sm:$0xff]   ;;  %v2001_v41 = vld [vmem:[#allocation2 + $0x224] ss:$8 sps:$4 sm:$0xff]  }
  0x29   :  { %v247_v33 = vpack.c.bf16 %v215_v32, %v213_v30  ;;  %v1990_v35 = vld [vmem:[#allocation2 + $0x200] ss:$8 sps:$4 sm:$0xff]   ;;  %v1993_v36 = vld [vmem:[#allocation2 + $0x14] ss:$8 sps:$4 sm:$0xff]   ;;  %v1997_v38 = vld [vmem:[#allocation2 + $0x10] ss:$8 sps:$4 sm:$0xff]  }
  0x2a   :  { %900 = vmatpush1.bf16.msra.mxu0 %v227_v37  ;;  %1973 = vmatpush1.bf16.msra.mxu1 %v227_v37  ;;  %v1995_v37 = vld [vmem:[#allocation2 + $0x214] ss:$8 sps:$4 sm:$0xff]   ;;  %v1998_v39 = vld [vmem:[#allocation2 + $0x210] ss:$8 sps:$4 sm:$0xff]   ;;  %v2003_v42 = vld [vmem:[#allocation2 + $0x20] ss:$8 sps:$4 sm:$0xff]  }
  0x2b   :  { %901 = vmatprep.subr.bf16.mxu0 %v230_v40  ;;  %1958 = vmatprep.subr.bf16.mxu1 %v230_v40  ;;  %v1999_v40 = vld [vmem:[#allocation2 + $0x24] ss:$8 sps:$4 sm:$0xff]   ;;  %v2004_v43 = vld [vmem:[#allocation2 + $0x220] ss:$8 sps:$4 sm:$0xff]   ;;  %v2005_v44 = vld [vmem:[#allocation2 + $0x34] ss:$8 sps:$4 sm:$0xff]  }
  0x2c   :  { %v2009_v46 = vld [vmem:[#allocation2 + $0x30] ss:$8 sps:$4 sm:$0xff]   ;;  %v2011_v48 = vld [vmem:[#allocation2 + $0x44] ss:$8 sps:$4 sm:$0xff]   ;;  %v2015_v50 = vld [vmem:[#allocation2 + $0x40] ss:$8 sps:$4 sm:$0xff]  }
  0x2d   :  { %v2013_v49 = vld [vmem:[#allocation2 + $0x244] ss:$8 sps:$4 sm:$0xff]   ;;  %v2017_v52 = vld [vmem:[#allocation2 + $0x54] ss:$8 sps:$4 sm:$0xff]   ;;  %v2022_v55 = vld [vmem:[#allocation2 + $0x250] ss:$8 sps:$4 sm:$0xff]  }
  0x2e   :  { %902 = vmatpush1.bf16.msra.mxu0 %v229_v45  ;;  %1974 = vmatpush1.bf16.msra.mxu1 %v229_v45  ;;  %v2007_v45 = vld [vmem:[#allocation2 + $0x234] ss:$8 sps:$4 sm:$0xff]   ;;  %v2023_v56 = vld [vmem:[#allocation2 + $0x64] ss:$8 sps:$4 sm:$0xff]   ;;  %v2027_v58 = vld [vmem:[#allocation2 + $0x60] ss:$8 sps:$4 sm:$0xff]  }
  0x2f   :  { %903 = vmatprep.subr.bf16.mxu0 %v232_v47  ;;  %1959 = vmatprep.subr.bf16.mxu1 %v232_v47  ;;  %v2010_v47 = vld [vmem:[#allocation2 + $0x230] ss:$8 sps:$4 sm:$0xff]   ;;  %v2019_v53 = vld [vmem:[#allocation2 + $0x254] ss:$8 sps:$4 sm:$0xff]   ;;  %v2035_v0 = vld [vmem:[#allocation2 + $0x84] ss:$8 sps:$4 sm:$0xff]  }
  0x30   :  { %v2029_v60 = vld [vmem:[#allocation2 + $0x74] ss:$8 sps:$4 sm:$0xff]   ;;  %v2033_v62 = vld [vmem:[#allocation2 + $0x70] ss:$8 sps:$4 sm:$0xff]   ;;  %v2037_v1 = vld [vmem:[#allocation2 + $0x284] ss:$8 sps:$4 sm:$0xff]  }
  0x31   :  { %v2031_v61 = vld [vmem:[#allocation2 + $0x274] ss:$8 sps:$4 sm:$0xff]   ;;  %v2040_v3 = vld [vmem:[#allocation2 + $0x280] ss:$8 sps:$4 sm:$0xff]   ;;  %v2045_v6 = vld [vmem:[#allocation2 + $0x90] ss:$8 sps:$4 sm:$0xff]  }
  0x32   :  { %904 = vmatpush1.bf16.msra.mxu0 %v231_v51  ;;  %1975 = vmatpush1.bf16.msra.mxu1 %v231_v51  ;;  %v2016_v51 = vld [vmem:[#allocation2 + $0x240] ss:$8 sps:$4 sm:$0xff]   ;;  %v2041_v4 = vld [vmem:[#allocation2 + $0x94] ss:$8 sps:$4 sm:$0xff]   ;;  %v2047_v8 = vld [vmem:[#allocation2 + $0xa4] ss:$8 sps:$4 sm:$0xff]  }
  0x33   :  { %905 = vmatprep.subr.bf16.mxu0 %v234_v54  ;;  %1960 = vmatprep.subr.bf16.mxu1 %v234_v54  ;;  %v2021_v54 = vld [vmem:[#allocation2 + $0x50] ss:$8 sps:$4 sm:$0xff]   ;;  %v2049_v9 = vld [vmem:[#allocation2 + $0x2a4] ss:$8 sps:$4 sm:$0xff]   ;;  %v2051_v10 = vld [vmem:[#allocation2 + $0xa0] ss:$8 sps:$4 sm:$0xff]  }
  0x34   :  { %v2053_v12 = vld [vmem:[#allocation2 + $0xb4] ss:$8 sps:$4 sm:$0xff]   ;;  %v2058_v15 = vld [vmem:[#allocation2 + $0x2b0] ss:$8 sps:$4 sm:$0xff]   ;;  %v2059_v16 = vld [vmem:[#allocation2 + $0xc4] ss:$8 sps:$4 sm:$0xff]  }
  0x35   :  { %v2055_v13 = vld [vmem:[#allocation2 + $0x2b4] ss:$8 sps:$4 sm:$0xff]   ;;  %v2063_v18 = vld [vmem:[#allocation2 + $0xc0] ss:$8 sps:$4 sm:$0xff]   ;;  %v2069_v22 = vld [vmem:[#allocation2 + $0xd0] ss:$8 sps:$4 sm:$0xff]  }
  0x36   :  { %906 = vmatpush1.bf16.msra.mxu0 %v233_v57  ;;  %1976 = vmatpush1.bf16.msra.mxu1 %v233_v57  ;;  %v2025_v57 = vld [vmem:[#allocation2 + $0x264] ss:$8 sps:$4 sm:$0xff]   ;;  %v2065_v20 = vld [vmem:[#allocation2 + $0xd4] ss:$8 sps:$4 sm:$0xff]   ;;  %v2076_v27 = vld [vmem:[#allocation2 + $0x2e0] ss:$8 sps:$4 sm:$0xff]  }
  0x37   :  { %907 = vmatprep.subr.bf16.mxu0 %v236_v59  ;;  %1961 = vmatprep.subr.bf16.mxu1 %v236_v59  ;;  %v2028_v59 = vld [vmem:[#allocation2 + $0x260] ss:$8 sps:$4 sm:$0xff]   ;;  %v2067_v21 = vld [vmem:[#allocation2 + $0x2d4] ss:$8 sps:$4 sm:$0xff]   ;;  %v2071_v24 = vld [vmem:[#allocation2 + $0xe4] ss:$8 sps:$4 sm:$0xff]  }
  0x38   :  { %v2073_v25 = vld [vmem:[#allocation2 + $0x2e4] ss:$8 sps:$4 sm:$0xff]   ;;  %v2077_v28 = vld [vmem:[#allocation2 + $0xf4] ss:$8 sps:$4 sm:$0xff]   ;;  %v2081_v30 = vld [vmem:[#allocation2 + $0xf0] ss:$8 sps:$4 sm:$0xff]  }
  0x39   :  { %v2083_v32 = vld [vmem:[#allocation2 + $0x104] ss:$8 sps:$4 sm:$0xff]  }
  0x3a   :  { %908 = vmatpush1.bf16.msra.mxu0 %v235_v63  ;;  %1977 = vmatpush1.bf16.msra.mxu1 %v235_v63  ;;  %v2034_v63 = vld [vmem:[#allocation2 + $0x270] ss:$8 sps:$4 sm:$0xff]  }
  0x3b   :  { %909 = vmatprep.subr.bf16.mxu0 %v238_v2  ;;  %1962 = vmatprep.subr.bf16.mxu1 %v238_v2  ;;  %v2039_v2 = vld [vmem:[#allocation2 + $0x80] ss:$8 sps:$4 sm:$0xff]  }
  0x3e   :  { %910 = vmatpush1.bf16.msra.mxu0 %v237_v5  ;;  %1978 = vmatpush1.bf16.msra.mxu1 %v237_v5  ;;  %v2043_v5 = vld [vmem:[#allocation2 + $0x294] ss:$8 sps:$4 sm:$0xff]  }
  0x3f   :  { %911 = vmatprep.subr.bf16.mxu0 %v240_v7  ;;  %1963 = vmatprep.subr.bf16.mxu1 %v240_v7  ;;  %v2046_v7 = vld [vmem:[#allocation2 + $0x290] ss:$8 sps:$4 sm:$0xff]  }
  0x42   :  { %912 = vmatpush1.bf16.msra.mxu0 %v239_v11  ;;  %1979 = vmatpush1.bf16.msra.mxu1 %v239_v11  ;;  %v2052_v11 = vld [vmem:[#allocation2 + $0x2a0] ss:$8 sps:$4 sm:$0xff]  }
  0x43   :  { %913 = vmatprep.subr.bf16.mxu0 %v242_v14  ;;  %1964 = vmatprep.subr.bf16.mxu1 %v242_v14  ;;  %v2057_v14 = vld [vmem:[#allocation2 + $0xb0] ss:$8 sps:$4 sm:$0xff]  }
  0x46   :  { %914 = vmatpush1.bf16.msra.mxu0 %v241_v17  ;;  %1980 = vmatpush1.bf16.msra.mxu1 %v241_v17  ;;  %v2061_v17 = vld [vmem:[#allocation2 + $0x2c4] ss:$8 sps:$4 sm:$0xff]  }
  0x47   :  { %915 = vmatprep.subr.bf16.mxu0 %v244_v19  ;;  %1965 = vmatprep.subr.bf16.mxu1 %v244_v19  ;;  %v2064_v19 = vld [vmem:[#allocation2 + $0x2c0] ss:$8 sps:$4 sm:$0xff]  }
  0x4a   :  { %916 = vmatpush1.bf16.msra.mxu0 %v243_v23  ;;  %1981 = vmatpush1.bf16.msra.mxu1 %v243_v23  ;;  %v2070_v23 = vld [vmem:[#allocation2 + $0x2d0] ss:$8 sps:$4 sm:$0xff]  }
  0x4b   :  { %917 = vmatprep.subr.bf16.mxu0 %v246_v26  ;;  %1966 = vmatprep.subr.bf16.mxu1 %v246_v26  ;;  %v2075_v26 = vld [vmem:[#allocation2 + $0xe0] ss:$8 sps:$4 sm:$0xff]  }
  0x4e   :  { %918 = vmatpush1.bf16.msra.mxu0 %v245_v29  ;;  %1982 = vmatpush1.bf16.msra.mxu1 %v245_v29  ;;  %v2079_v29 = vld [vmem:[#allocation2 + $0x2f4] ss:$8 sps:$4 sm:$0xff]  }
  0x4f   :  { %919 = vmatprep.subr.bf16.mxu0 %v248_v31  ;;  %1967 = vmatprep.subr.bf16.mxu1 %v248_v31  ;;  %v2082_v31 = vld [vmem:[#allocation2 + $0x2f0] ss:$8 sps:$4 sm:$0xff]  }
  0x52   :  { %920 = vmatpush1.bf16.msra.mxu0 %v247_v33  ;;  %1983 = vmatpush1.bf16.msra.mxu1 %v247_v33  ;;  %v2085_v33 = vld [vmem:[#allocation2 + $0x304] ss:$8 sps:$4 sm:$0xff]  }
  0x55   :  { %922 = vmatmul.mubr.bf16.vlgmr.msra.gmra.mrb[0].mxu0 %v1987_v34  ;;  %1242 = vmatmul.mubr.bf16.vlgmr.msra.gmra.mrb[0].mxu1 %v1990_v35  ;;  %v2087_v34 = vld [vmem:[#allocation2 + $0x100] ss:$8 sps:$4 sm:$0xff]  }
  0x56   :  { %931 = vmatprep.mubr.bf16.mxu0 %v1993_v36  ;;  %1251 = vmatprep.mubr.bf16.mxu1 %v1995_v37  ;;  %v2088_v35 = vld [vmem:[#allocation2 + $0x300] ss:$8 sps:$4 sm:$0xff]   ;;  %v2089_v36 = vld [vmem:[#allocation2 + $0x114] ss:$8 sps:$4 sm:$0xff]  }
  0x57   :  { %v2091_v37 = vld [vmem:[#allocation2 + $0x314] ss:$8 sps:$4 sm:$0xff]  }
  0x5d   :  { %932 = vmatmul.mubr.bf16.gmra.mrb[4].mxu0 %v1997_v38  ;;  %1252 = vmatmul.mubr.bf16.gmra.mrb[4].mxu1 %v1998_v39  ;;  %v2093_v38 = vld [vmem:[#allocation2 + $0x110] ss:$8 sps:$4 sm:$0xff]  }
  0x5e   :  { %941 = vmatprep.mubr.bf16.mxu0 %v1999_v40  ;;  %1261 = vmatprep.mubr.bf16.mxu1 %v2001_v41  ;;  %v2094_v39 = vld [vmem:[#allocation2 + $0x310] ss:$8 sps:$4 sm:$0xff]   ;;  %v2095_v40 = vld [vmem:[#allocation2 + $0x124] ss:$8 sps:$4 sm:$0xff]  }
  0x5f   :  { %v2097_v41 = vld [vmem:[#allocation2 + $0x324] ss:$8 sps:$4 sm:$0xff]  }
  0x65   :  { %942 = vmatmul.mubr.bf16.gmra.mrb[8].mxu0 %v2003_v42  ;;  %1262 = vmatmul.mubr.bf16.gmra.mrb[8].mxu1 %v2004_v43  ;;  %v2099_v42 = vld [vmem:[#allocation2 + $0x120] ss:$8 sps:$4 sm:$0xff]  }
  0x66   :  { %951 = vmatprep.mubr.bf16.mxu0 %v2005_v44  ;;  %1271 = vmatprep.mubr.bf16.mxu1 %v2007_v45  ;;  %v2100_v43 = vld [vmem:[#allocation2 + $0x320] ss:$8 sps:$4 sm:$0xff]   ;;  %v2101_v44 = vld [vmem:[#allocation2 + $0x134] ss:$8 sps:$4 sm:$0xff]  }
  0x67   :  { %v2103_v45 = vld [vmem:[#allocation2 + $0x334] ss:$8 sps:$4 sm:$0xff]  }
  0x6d   :  { %952 = vmatmul.mubr.bf16.gmra.mrb[12].mxu0 %v2009_v46  ;;  %1272 = vmatmul.mubr.bf16.gmra.mrb[12].mxu1 %v2010_v47  ;;  %v2105_v46 = vld [vmem:[#allocation2 + $0x130] ss:$8 sps:$4 sm:$0xff]  }
  0x6e   :  { %961 = vmatprep.mubr.bf16.mxu0 %v2011_v48  ;;  %1281 = vmatprep.mubr.bf16.mxu1 %v2013_v49  ;;  %v2106_v47 = vld [vmem:[#allocation2 + $0x330] ss:$8 sps:$4 sm:$0xff]   ;;  %v2107_v48 = vld [vmem:[#allocation2 + $0x144] ss:$8 sps:$4 sm:$0xff]  }
  0x6f   :  { %v2109_v49 = vld [vmem:[#allocation2 + $0x344] ss:$8 sps:$4 sm:$0xff]  }
  0x75   :  { %962 = vmatmul.mubr.bf16.gmra.mrb[16].mxu0 %v2015_v50  ;;  %1282 = vmatmul.mubr.bf16.gmra.mrb[16].mxu1 %v2016_v51  ;;  %v2111_v50 = vld [vmem:[#allocation2 + $0x140] ss:$8 sps:$4 sm:$0xff]  }
  0x76   :  { %971 = vmatprep.mubr.bf16.mxu0 %v2017_v52  ;;  %1291 = vmatprep.mubr.bf16.mxu1 %v2019_v53  ;;  %v2112_v51 = vld [vmem:[#allocation2 + $0x340] ss:$8 sps:$4 sm:$0xff]   ;;  %v2113_v52 = vld [vmem:[#allocation2 + $0x154] ss:$8 sps:$4 sm:$0xff]  }
  0x77   :  { %v2115_v53 = vld [vmem:[#allocation2 + $0x354] ss:$8 sps:$4 sm:$0xff]  }
  0x7d   :  { %972 = vmatmul.mubr.bf16.gmra.mrb[20].mxu0 %v2021_v54  ;;  %1292 = vmatmul.mubr.bf16.gmra.mrb[20].mxu1 %v2022_v55  ;;  %v2117_v54 = vld [vmem:[#allocation2 + $0x150] ss:$8 sps:$4 sm:$0xff]  }
  0x7e   :  { %981 = vmatprep.mubr.bf16.mxu0 %v2023_v56  ;;  %1301 = vmatprep.mubr.bf16.mxu1 %v2025_v57  ;;  %v2118_v55 = vld [vmem:[#allocation2 + $0x350] ss:$8 sps:$4 sm:$0xff]   ;;  %v2119_v56 = vld [vmem:[#allocation2 + $0x164] ss:$8 sps:$4 sm:$0xff]  }
  0x7f   :  { %v2121_v57 = vld [vmem:[#allocation2 + $0x364] ss:$8 sps:$4 sm:$0xff]  }
  0x85   :  { %982 = vmatmul.mubr.bf16.gmra.mrb[24].mxu0 %v2027_v58  ;;  %1302 = vmatmul.mubr.bf16.gmra.mrb[24].mxu1 %v2028_v59  ;;  %v2123_v58 = vld [vmem:[#allocation2 + $0x160] ss:$8 sps:$4 sm:$0xff]  }
  0x86   :  { %991 = vmatprep.mubr.bf16.mxu0 %v2029_v60  ;;  %1311 = vmatprep.mubr.bf16.mxu1 %v2031_v61  ;;  %v2124_v59 = vld [vmem:[#allocation2 + $0x360] ss:$8 sps:$4 sm:$0xff]   ;;  %v2125_v60 = vld [vmem:[#allocation2 + $0x174] ss:$8 sps:$4 sm:$0xff]  }
  0x87   :  { %v2127_v61 = vld [vmem:[#allocation2 + $0x374] ss:$8 sps:$4 sm:$0xff]  }
  0x8d   :  { %992 = vmatmul.mubr.bf16.gmra.mrb[28].mxu0 %v2033_v62  ;;  %1312 = vmatmul.mubr.bf16.gmra.mrb[28].mxu1 %v2034_v63  ;;  %v2129_v62 = vld [vmem:[#allocation2 + $0x170] ss:$8 sps:$4 sm:$0xff]  }
  0x8e   :  { %1001 = vmatprep.mubr.bf16.mxu0 %v2035_v0  ;;  %1321 = vmatprep.mubr.bf16.mxu1 %v2037_v1  ;;  %v2130_v63 = vld [vmem:[#allocation2 + $0x370] ss:$8 sps:$4 sm:$0xff]   ;;  %v2131_v0 = vld [vmem:[#allocation2 + $0x184] ss:$8 sps:$4 sm:$0xff]  }
  0x8f   :  { %v2133_v1 = vld [vmem:[#allocation2 + $0x384] ss:$8 sps:$4 sm:$0xff]  }
  0x95   :  { %1002 = vmatmul.mubr.bf16.gmra.mrb[32].mxu0 %v2039_v2  ;;  %1322 = vmatmul.mubr.bf16.gmra.mrb[32].mxu1 %v2040_v3  ;;  %v2135_v2 = vld [vmem:[#allocation2 + $0x180] ss:$8 sps:$4 sm:$0xff]  }
  0x96   :  { %1011 = vmatprep.mubr.bf16.mxu0 %v2041_v4  ;;  %1331 = vmatprep.mubr.bf16.mxu1 %v2043_v5  ;;  %v2136_v3 = vld [vmem:[#allocation2 + $0x380] ss:$8 sps:$4 sm:$0xff]   ;;  %v2137_v4 = vld [vmem:[#allocation2 + $0x194] ss:$8 sps:$4 sm:$0xff]  }
  0x97   :  { %v2139_v5 = vld [vmem:[#allocation2 + $0x394] ss:$8 sps:$4 sm:$0xff]  }
  0x9d   :  { %1012 = vmatmul.mubr.bf16.gmra.mrb[36].mxu0 %v2045_v6  ;;  %1332 = vmatmul.mubr.bf16.gmra.mrb[36].mxu1 %v2046_v7  ;;  %v2141_v6 = vld [vmem:[#allocation2 + $0x190] ss:$8 sps:$4 sm:$0xff]  }
  0x9e   :  { %1021 = vmatprep.mubr.bf16.mxu0 %v2047_v8  ;;  %1341 = vmatprep.mubr.bf16.mxu1 %v2049_v9  ;;  %v2142_v7 = vld [vmem:[#allocation2 + $0x390] ss:$8 sps:$4 sm:$0xff]   ;;  %v2143_v8 = vld [vmem:[#allocation2 + $0x1a4] ss:$8 sps:$4 sm:$0xff]  }
  0x9f   :  { %v2145_v9 = vld [vmem:[#allocation2 + $0x3a4] ss:$8 sps:$4 sm:$0xff]  }
  0xa5   :  { %1022 = vmatmul.mubr.bf16.gmra.mrb[40].mxu0 %v2051_v10  ;;  %1342 = vmatmul.mubr.bf16.gmra.mrb[40].mxu1 %v2052_v11  ;;  %v2147_v10 = vld [vmem:[#allocation2 + $0x1a0] ss:$8 sps:$4 sm:$0xff]  }
  0xa6   :  { %1031 = vmatprep.mubr.bf16.mxu0 %v2053_v12  ;;  %1351 = vmatprep.mubr.bf16.mxu1 %v2055_v13  ;;  %v2148_v11 = vld [vmem:[#allocation2 + $0x3a0] ss:$8 sps:$4 sm:$0xff]   ;;  %v2149_v12 = vld [vmem:[#allocation2 + $0x1b4] ss:$8 sps:$4 sm:$0xff]  }
  0xa7   :  { %v2151_v13 = vld [vmem:[#allocation2 + $0x3b4] ss:$8 sps:$4 sm:$0xff]  }
  0xad   :  { %1032 = vmatmul.mubr.bf16.gmra.mrb[44].mxu0 %v2057_v14  ;;  %1352 = vmatmul.mubr.bf16.gmra.mrb[44].mxu1 %v2058_v15 }
  0xae   :  { %1041 = vmatprep.mubr.bf16.mxu0 %v2059_v16  ;;  %1361 = vmatprep.mubr.bf16.mxu1 %v2061_v17 }
  0xb5   :  { %1042 = vmatmul.mubr.bf16.gmra.mrb[48].mxu0 %v2063_v18  ;;  %1362 = vmatmul.mubr.bf16.gmra.mrb[48].mxu1 %v2064_v19  ;;  %v2153_v18 = vld [vmem:[#allocation2 + $0x1b0] ss:$8 sps:$4 sm:$0xff]  }
  0xb6   :  { %1051 = vmatprep.mubr.bf16.mxu0 %v2065_v20  ;;  %1371 = vmatprep.mubr.bf16.mxu1 %v2067_v21  ;;  %v2154_v19 = vld [vmem:[#allocation2 + $0x3b0] ss:$8 sps:$4 sm:$0xff]  }
  0xbd   :  { %1052 = vmatmul.mubr.bf16.gmra.mrb[52].mxu0 %v2069_v22  ;;  %1372 = vmatmul.mubr.bf16.gmra.mrb[52].mxu1 %v2070_v23  ;;  %v2155_v22 = vld [vmem:[#allocation2 + $0x1c4] ss:$8 sps:$4 sm:$0xff]  }
  0xbe   :  { %1061 = vmatprep.mubr.bf16.mxu0 %v2071_v24  ;;  %1381 = vmatprep.mubr.bf16.mxu1 %v2073_v25  ;;  %v2157_v23 = vld [vmem:[#allocation2 + $0x3c4] ss:$8 sps:$4 sm:$0xff]  }
  0xc5   :  { %1062 = vmatmul.mubr.bf16.gmra.mrb[56].mxu0 %v2075_v26  ;;  %1382 = vmatmul.mubr.bf16.gmra.mrb[56].mxu1 %v2076_v27 }
  0xc6   :  { %1071 = vmatprep.mubr.bf16.mxu0 %v2077_v28  ;;  %1391 = vmatprep.mubr.bf16.mxu1 %v2079_v29 }
  0xcd   :  { %1072 = vmatmul.mubr.bf16.gmra.mrb[60].mxu0 %v2081_v30  ;;  %1392 = vmatmul.mubr.bf16.gmra.mrb[60].mxu1 %v2082_v31  ;;  %v2159_v30 = vld [vmem:[#allocation2 + $0x1c0] ss:$8 sps:$4 sm:$0xff]  }
  0xce   :  { %1081 = vmatprep.mubr.bf16.mxu0 %v2083_v32  ;;  %1401 = vmatprep.mubr.bf16.mxu1 %v2085_v33  ;;  %v2160_v31 = vld [vmem:[#allocation2 + $0x3c0] ss:$8 sps:$4 sm:$0xff]  }
  0xd5   :  { %1082 = vmatmul.mubr.bf16.gmra.mrb[64].mxu0 %v2087_v34  ;;  %1402 = vmatmul.mubr.bf16.gmra.mrb[64].mxu1 %v2088_v35  ;;  %v2161_v34 = vld [vmem:[#allocation2 + $0x1d4] ss:$8 sps:$4 sm:$0xff]  }
  0xd6   :  { %1091 = vmatprep.mubr.bf16.mxu0 %v2089_v36  ;;  %1411 = vmatprep.mubr.bf16.mxu1 %v2091_v37  ;;  %v2163_v35 = vld [vmem:[#allocation2 + $0x3d4] ss:$8 sps:$4 sm:$0xff]  }
  0xdd   :  { %1092 = vmatmul.mubr.bf16.gmra.mrb[68].mxu0 %v2093_v38  ;;  %1412 = vmatmul.mubr.bf16.gmra.mrb[68].mxu1 %v2094_v39 }
  0xde   :  { %1101 = vmatprep.mubr.bf16.mxu0 %v2095_v40  ;;  %1421 = vmatprep.mubr.bf16.mxu1 %v2097_v41 }
  0xe5   :  { %1102 = vmatmul.mubr.bf16.gmra.mrb[72].mxu0 %v2099_v42  ;;  %1422 = vmatmul.mubr.bf16.gmra.mrb[72].mxu1 %v2100_v43  ;;  %v2165_v42 = vld [vmem:[#allocation2 + $0x1d0] ss:$8 sps:$4 sm:$0xff]  }
  0xe6   :  { %1111 = vmatprep.mubr.bf16.mxu0 %v2101_v44  ;;  %1431 = vmatprep.mubr.bf16.mxu1 %v2103_v45  ;;  %v2166_v43 = vld [vmem:[#allocation2 + $0x3d0] ss:$8 sps:$4 sm:$0xff]  }
  0xed   :  { %1112 = vmatmul.mubr.bf16.gmra.mrb[76].mxu0 %v2105_v46  ;;  %1432 = vmatmul.mubr.bf16.gmra.mrb[76].mxu1 %v2106_v47  ;;  %v2167_v46 = vld [vmem:[#allocation2 + $0x1e4] ss:$8 sps:$4 sm:$0xff]  }
  0xee   :  { %1121 = vmatprep.mubr.bf16.mxu0 %v2107_v48  ;;  %1441 = vmatprep.mubr.bf16.mxu1 %v2109_v49  ;;  %v2169_v47 = vld [vmem:[#allocation2 + $0x3e4] ss:$8 sps:$4 sm:$0xff]  }
  0xf5   :  { %1122 = vmatmul.mubr.bf16.gmra.mrb[80].mxu0 %v2111_v50  ;;  %1442 = vmatmul.mubr.bf16.gmra.mrb[80].mxu1 %v2112_v51 }
  0xf6   :  { %1131 = vmatprep.mubr.bf16.mxu0 %v2113_v52  ;;  %1451 = vmatprep.mubr.bf16.mxu1 %v2115_v53 }
  0xfd   :  { %1132 = vmatmul.mubr.bf16.gmra.mrb[84].mxu0 %v2117_v54  ;;  %1452 = vmatmul.mubr.bf16.gmra.mrb[84].mxu1 %v2118_v55  ;;  %v2171_v54 = vld [vmem:[#allocation2 + $0x1e0] ss:$8 sps:$4 sm:$0xff]  }
  0xfe   :  { %1141 = vmatprep.mubr.bf16.mxu0 %v2119_v56  ;;  %1461 = vmatprep.mubr.bf16.mxu1 %v2121_v57  ;;  %v2172_v55 = vld [vmem:[#allocation2 + $0x3e0] ss:$8 sps:$4 sm:$0xff]  }
 0x105   :  { %1142 = vmatmul.mubr.bf16.gmra.mrb[88].mxu0 %v2123_v58  ;;  %1462 = vmatmul.mubr.bf16.gmra.mrb[88].mxu1 %v2124_v59  ;;  %v2173_v58 = vld [vmem:[#allocation2 + $0x1f4] ss:$8 sps:$4 sm:$0xff]  }
 0x106   :  { %1151 = vmatprep.mubr.bf16.mxu0 %v2125_v60  ;;  %1471 = vmatprep.mubr.bf16.mxu1 %v2127_v61  ;;  %v2175_v59 = vld [vmem:[#allocation2 + $0x3f4] ss:$8 sps:$4 sm:$0xff]  }
 0x10d   :  { %1152 = vmatmul.mubr.bf16.gmra.mrb[92].mxu0 %v2129_v62  ;;  %1472 = vmatmul.mubr.bf16.gmra.mrb[92].mxu1 %v2130_v63 }
 0x10e   :  { %1161 = vmatprep.mubr.bf16.mxu0 %v2131_v0  ;;  %1481 = vmatprep.mubr.bf16.mxu1 %v2133_v1 }
 0x115   :  { %1162 = vmatmul.mubr.bf16.gmra.mrb[96].mxu0 %v2135_v2  ;;  %1482 = vmatmul.mubr.bf16.gmra.mrb[96].mxu1 %v2136_v3  ;;  %v2177_v2 = vld [vmem:[#allocation2 + $0x1f0] ss:$8 sps:$4 sm:$0xff]  }
 0x116   :  { %1171 = vmatprep.mubr.bf16.mxu0 %v2137_v4  ;;  %1491 = vmatprep.mubr.bf16.mxu1 %v2139_v5  ;;  %v2178_v3 = vld [vmem:[#allocation2 + $0x3f0] ss:$8 sps:$4 sm:$0xff]  }
 0x11d   :  { %1172 = vmatmul.mubr.bf16.gmra.mrb[100].mxu0 %v2141_v6  ;;  %1492 = vmatmul.mubr.bf16.gmra.mrb[100].mxu1 %v2142_v7 }
 0x11e   :  { %1181 = vmatprep.mubr.bf16.mxu0 %v2143_v8  ;;  %1501 = vmatprep.mubr.bf16.mxu1 %v2145_v9 }
 0x125   :  { %1182 = vmatmul.mubr.bf16.gmra.mrb[104].mxu0 %v2147_v10  ;;  %1502 = vmatmul.mubr.bf16.gmra.mrb[104].mxu1 %v2148_v11 }
 0x126   :  { %1191 = vmatprep.mubr.bf16.mxu0 %v2149_v12  ;;  %1511 = vmatprep.mubr.bf16.mxu1 %v2151_v13 }
 0x128   :  { %v923_v14 = vpop.f32.mrb[0].mxu0  ;;  %v1243_v15 = vpop.f32.mrb[0].mxu1 }
 0x129   :  { %1562 = vst [vmem:[%s3323_s2] sm:$0xff] %v923_v14  ;;  %1691 = vst [vmem:[%s3323_s2 + $0x400] sm:$0xff] %v1243_v15  ;;  %v925_v16 = vpop.f32.mrb[1].mxu0  ;;  %v1245_v17 = vpop.f32.mrb[1].mxu1 }
 0x12a   :  { %1564 = vst.msk [vmem:[%s3323_s2 + $0x8] sm:$0xff] %vm1563_vm0, %v925_v16  ;;  %1692 = vst.msk [vmem:[%s3323_s2 + $0x408] sm:$0xff] %vm1563_vm0, %v1245_v17  ;;  %v927_v20 = vpop.f32.mrb[2].mxu0  ;;  %v1247_v21 = vpop.f32.mrb[2].mxu1 }
 0x12b   :  { %1565 = vst [vmem:[%s3323_s2 + $0x10] sm:$0xff] %v927_v20  ;;  %1693 = vst [vmem:[%s3323_s2 + $0x410] sm:$0xff] %v1247_v21  ;;  %v929_v24 = vpop.f32.mrb[3].mxu0  ;;  %v1249_v25 = vpop.f32.mrb[3].mxu1 }
 0x12c   :  { %1566 = vst.msk [vmem:[%s3323_s2 + $0x18] sm:$0xff] %vm1563_vm0, %v929_v24  ;;  %1694 = vst.msk [vmem:[%s3323_s2 + $0x418] sm:$0xff] %vm1563_vm0, %v1249_v25 }
 0x12d   :  { %1192 = vmatmul.mubr.bf16.gmra.mrb[108].mxu0 %v2153_v18  ;;  %1512 = vmatmul.mubr.bf16.gmra.mrb[108].mxu1 %v2154_v19 }
 0x12e   :  { %1201 = vmatprep.mubr.bf16.mxu0 %v2155_v22  ;;  %1521 = vmatprep.mubr.bf16.mxu1 %v2157_v23 }
 0x130   :  { %v933_v26 = vpop.f32.mrb[4].mxu0  ;;  %v1253_v27 = vpop.f32.mrb[4].mxu1 }
 0x131   :  { %1567 = vst [vmem:[%s3323_s2 + $0x20] sm:$0xff] %v933_v26  ;;  %1695 = vst [vmem:[%s3323_s2 + $0x420] sm:$0xff] %v1253_v27  ;;  %v935_v28 = vpop.f32.mrb[5].mxu0  ;;  %v1255_v29 = vpop.f32.mrb[5].mxu1 }
 0x132   :  { %1568 = vst.msk [vmem:[%s3323_s2 + $0x28] sm:$0xff] %vm1563_vm0, %v935_v28  ;;  %1696 = vst.msk [vmem:[%s3323_s2 + $0x428] sm:$0xff] %vm1563_vm0, %v1255_v29  ;;  %v937_v32 = vpop.f32.mrb[6].mxu0  ;;  %v1257_v33 = vpop.f32.mrb[6].mxu1 }
 0x133   :  { %1569 = vst [vmem:[%s3323_s2 + $0x30] sm:$0xff] %v937_v32  ;;  %1697 = vst [vmem:[%s3323_s2 + $0x430] sm:$0xff] %v1257_v33  ;;  %v939_v36 = vpop.f32.mrb[7].mxu0  ;;  %v1259_v37 = vpop.f32.mrb[7].mxu1 }
 0x134   :  { %1570 = vst.msk [vmem:[%s3323_s2 + $0x38] sm:$0xff] %vm1563_vm0, %v939_v36  ;;  %1698 = vst.msk [vmem:[%s3323_s2 + $0x438] sm:$0xff] %vm1563_vm0, %v1259_v37 }
 0x135   :  { %1202 = vmatmul.mubr.bf16.gmra.mrb[112].mxu0 %v2159_v30  ;;  %1522 = vmatmul.mubr.bf16.gmra.mrb[112].mxu1 %v2160_v31 }
 0x136   :  { %1211 = vmatprep.mubr.bf16.mxu0 %v2161_v34  ;;  %1531 = vmatprep.mubr.bf16.mxu1 %v2163_v35 }
 0x138   :  { %v943_v38 = vpop.f32.mrb[8].mxu0  ;;  %v1263_v39 = vpop.f32.mrb[8].mxu1 }
 0x139   :  { %1571 = vst [vmem:[%s3323_s2 + $0x40] sm:$0xff] %v943_v38  ;;  %1699 = vst [vmem:[%s3323_s2 + $0x440] sm:$0xff] %v1263_v39  ;;  %v945_v40 = vpop.f32.mrb[9].mxu0  ;;  %v1265_v41 = vpop.f32.mrb[9].mxu1 }
 0x13a   :  { %1572 = vst.msk [vmem:[%s3323_s2 + $0x48] sm:$0xff] %vm1563_vm0, %v945_v40  ;;  %1700 = vst.msk [vmem:[%s3323_s2 + $0x448] sm:$0xff] %vm1563_vm0, %v1265_v41  ;;  %v947_v44 = vpop.f32.mrb[10].mxu0  ;;  %v1267_v45 = vpop.f32.mrb[10].mxu1 }
 0x13b   :  { %1573 = vst [vmem:[%s3323_s2 + $0x50] sm:$0xff] %v947_v44  ;;  %1701 = vst [vmem:[%s3323_s2 + $0x450] sm:$0xff] %v1267_v45  ;;  %v949_v48 = vpop.f32.mrb[11].mxu0  ;;  %v1269_v49 = vpop.f32.mrb[11].mxu1 }
 0x13c   :  { %1574 = vst.msk [vmem:[%s3323_s2 + $0x58] sm:$0xff] %vm1563_vm0, %v949_v48  ;;  %1702 = vst.msk [vmem:[%s3323_s2 + $0x458] sm:$0xff] %vm1563_vm0, %v1269_v49 }
 0x13d   :  { %1212 = vmatmul.mubr.bf16.gmra.mrb[116].mxu0 %v2165_v42  ;;  %1532 = vmatmul.mubr.bf16.gmra.mrb[116].mxu1 %v2166_v43 }
 0x13e   :  { %1221 = vmatprep.mubr.bf16.mxu0 %v2167_v46  ;;  %1541 = vmatprep.mubr.bf16.mxu1 %v2169_v47 }
 0x140   :  { %v953_v50 = vpop.f32.mrb[12].mxu0  ;;  %v1273_v51 = vpop.f32.mrb[12].mxu1 }
 0x141   :  { %1575 = vst [vmem:[%s3323_s2 + $0x60] sm:$0xff] %v953_v50  ;;  %1703 = vst [vmem:[%s3323_s2 + $0x460] sm:$0xff] %v1273_v51  ;;  %v955_v52 = vpop.f32.mrb[13].mxu0  ;;  %v1275_v53 = vpop.f32.mrb[13].mxu1 }
 0x142   :  { %1576 = vst.msk [vmem:[%s3323_s2 + $0x68] sm:$0xff] %vm1563_vm0, %v955_v52  ;;  %1704 = vst.msk [vmem:[%s3323_s2 + $0x468] sm:$0xff] %vm1563_vm0, %v1275_v53  ;;  %v957_v56 = vpop.f32.mrb[14].mxu0  ;;  %v1277_v57 = vpop.f32.mrb[14].mxu1 }
 0x143   :  { %1577 = vst [vmem:[%s3323_s2 + $0x70] sm:$0xff] %v957_v56  ;;  %1705 = vst [vmem:[%s3323_s2 + $0x470] sm:$0xff] %v1277_v57  ;;  %v959_v60 = vpop.f32.mrb[15].mxu0  ;;  %v1279_v61 = vpop.f32.mrb[15].mxu1 }
 0x144   :  { %1578 = vst.msk [vmem:[%s3323_s2 + $0x78] sm:$0xff] %vm1563_vm0, %v959_v60  ;;  %1706 = vst.msk [vmem:[%s3323_s2 + $0x478] sm:$0xff] %vm1563_vm0, %v1279_v61 }
 0x145   :  { %1222 = vmatmul.mubr.bf16.gmra.mrb[120].mxu0 %v2171_v54  ;;  %1542 = vmatmul.mubr.bf16.gmra.mrb[120].mxu1 %v2172_v55 }
 0x146   :  { %1231 = vmatprep.mubr.bf16.mxu0 %v2173_v58  ;;  %1551 = vmatprep.mubr.bf16.mxu1 %v2175_v59 }
 0x148   :  { %v963_v62 = vpop.f32.mrb[16].mxu0  ;;  %v1283_v63 = vpop.f32.mrb[16].mxu1 }
 0x149   :  { %1579 = vst [vmem:[%s3323_s2 + $0x80] sm:$0xff] %v963_v62  ;;  %1707 = vst [vmem:[%s3323_s2 + $0x480] sm:$0xff] %v1283_v63  ;;  %v965_v0 = vpop.f32.mrb[17].mxu0  ;;  %v1285_v1 = vpop.f32.mrb[17].mxu1 }
 0x14a   :  { %1580 = vst.msk [vmem:[%s3323_s2 + $0x88] sm:$0xff] %vm1563_vm0, %v965_v0  ;;  %1708 = vst.msk [vmem:[%s3323_s2 + $0x488] sm:$0xff] %vm1563_vm0, %v1285_v1  ;;  %v967_v4 = vpop.f32.mrb[18].mxu0  ;;  %v1287_v5 = vpop.f32.mrb[18].mxu1 }
 0x14b   :  { %1581 = vst [vmem:[%s3323_s2 + $0x90] sm:$0xff] %v967_v4  ;;  %1709 = vst [vmem:[%s3323_s2 + $0x490] sm:$0xff] %v1287_v5  ;;  %v969_v6 = vpop.f32.mrb[19].mxu0  ;;  %v1289_v7 = vpop.f32.mrb[19].mxu1 }
 0x14c   :  { %1582 = vst.msk [vmem:[%s3323_s2 + $0x98] sm:$0xff] %vm1563_vm0, %v969_v6  ;;  %1710 = vst.msk [vmem:[%s3323_s2 + $0x498] sm:$0xff] %vm1563_vm0, %v1289_v7 }
 0x14d   :  { %1232 = vmatmul.mubr.bf16.gmra.mrb[124].mxu0 %v2177_v2  ;;  %1552 = vmatmul.mubr.bf16.gmra.mrb[124].mxu1 %v2178_v3 }
 0x150   :  { %v973_v8 = vpop.f32.mrb[20].mxu0  ;;  %v1293_v9 = vpop.f32.mrb[20].mxu1 }
 0x151   :  { %1583 = vst [vmem:[%s3323_s2 + $0xa0] sm:$0xff] %v973_v8  ;;  %1711 = vst [vmem:[%s3323_s2 + $0x4a0] sm:$0xff] %v1293_v9  ;;  %v975_v10 = vpop.f32.mrb[21].mxu0  ;;  %v1295_v11 = vpop.f32.mrb[21].mxu1 }
 0x152   :  { %1584 = vst.msk [vmem:[%s3323_s2 + $0xa8] sm:$0xff] %vm1563_vm0, %v975_v10  ;;  %1712 = vst.msk [vmem:[%s3323_s2 + $0x4a8] sm:$0xff] %vm1563_vm0, %v1295_v11  ;;  %v977_v12 = vpop.f32.mrb[22].mxu0  ;;  %v1297_v13 = vpop.f32.mrb[22].mxu1 }
 0x153   :  { %1585 = vst [vmem:[%s3323_s2 + $0xb0] sm:$0xff] %v977_v12  ;;  %1713 = vst [vmem:[%s3323_s2 + $0x4b0] sm:$0xff] %v1297_v13  ;;  %v979_v14 = vpop.f32.mrb[23].mxu0  ;;  %v1299_v15 = vpop.f32.mrb[23].mxu1 }
 0x154   :  { %1586 = vst.msk [vmem:[%s3323_s2 + $0xb8] sm:$0xff] %vm1563_vm0, %v979_v14  ;;  %1714 = vst.msk [vmem:[%s3323_s2 + $0x4b8] sm:$0xff] %vm1563_vm0, %v1299_v15 }
 0x158   :  { %v983_v16 = vpop.f32.mrb[24].mxu0  ;;  %v1303_v17 = vpop.f32.mrb[24].mxu1 }
 0x159   :  { %1587 = vst [vmem:[%s3323_s2 + $0xc0] sm:$0xff] %v983_v16  ;;  %1715 = vst [vmem:[%s3323_s2 + $0x4c0] sm:$0xff] %v1303_v17  ;;  %v985_v18 = vpop.f32.mrb[25].mxu0  ;;  %v1305_v19 = vpop.f32.mrb[25].mxu1 }
 0x15a   :  { %1588 = vst.msk [vmem:[%s3323_s2 + $0xc8] sm:$0xff] %vm1563_vm0, %v985_v18  ;;  %1716 = vst.msk [vmem:[%s3323_s2 + $0x4c8] sm:$0xff] %vm1563_vm0, %v1305_v19  ;;  %v987_v20 = vpop.f32.mrb[26].mxu0  ;;  %v1307_v21 = vpop.f32.mrb[26].mxu1 }
 0x15b   :  { %1589 = vst [vmem:[%s3323_s2 + $0xd0] sm:$0xff] %v987_v20  ;;  %1717 = vst [vmem:[%s3323_s2 + $0x4d0] sm:$0xff] %v1307_v21  ;;  %v989_v22 = vpop.f32.mrb[27].mxu0  ;;  %v1309_v23 = vpop.f32.mrb[27].mxu1 }
 0x15c   :  { %1590 = vst.msk [vmem:[%s3323_s2 + $0xd8] sm:$0xff] %vm1563_vm0, %v989_v22  ;;  %1718 = vst.msk [vmem:[%s3323_s2 + $0x4d8] sm:$0xff] %vm1563_vm0, %v1309_v23 }
 0x160   :  { %v993_v24 = vpop.f32.mrb[28].mxu0  ;;  %v1313_v25 = vpop.f32.mrb[28].mxu1 }
 0x161   :  { %1591 = vst [vmem:[%s3323_s2 + $0xe0] sm:$0xff] %v993_v24  ;;  %1719 = vst [vmem:[%s3323_s2 + $0x4e0] sm:$0xff] %v1313_v25  ;;  %v995_v26 = vpop.f32.mrb[29].mxu0  ;;  %v1315_v27 = vpop.f32.mrb[29].mxu1 }
 0x162   :  { %1592 = vst.msk [vmem:[%s3323_s2 + $0xe8] sm:$0xff] %vm1563_vm0, %v995_v26  ;;  %1720 = vst.msk [vmem:[%s3323_s2 + $0x4e8] sm:$0xff] %vm1563_vm0, %v1315_v27  ;;  %v997_v28 = vpop.f32.mrb[30].mxu0  ;;  %v1317_v29 = vpop.f32.mrb[30].mxu1 }
 0x163   :  { %1593 = vst [vmem:[%s3323_s2 + $0xf0] sm:$0xff] %v997_v28  ;;  %1721 = vst [vmem:[%s3323_s2 + $0x4f0] sm:$0xff] %v1317_v29  ;;  %v999_v30 = vpop.f32.mrb[31].mxu0  ;;  %v1319_v31 = vpop.f32.mrb[31].mxu1 }
 0x164   :  { %1594 = vst.msk [vmem:[%s3323_s2 + $0xf8] sm:$0xff] %vm1563_vm0, %v999_v30  ;;  %1722 = vst.msk [vmem:[%s3323_s2 + $0x4f8] sm:$0xff] %vm1563_vm0, %v1319_v31 }
 0x168   :  { %v1003_v32 = vpop.f32.mrb[32].mxu0  ;;  %v1323_v33 = vpop.f32.mrb[32].mxu1 }
 0x169   :  { %1595 = vst [vmem:[%s3323_s2 + $0x100] sm:$0xff] %v1003_v32  ;;  %1723 = vst [vmem:[%s3323_s2 + $0x500] sm:$0xff] %v1323_v33  ;;  %v1005_v34 = vpop.f32.mrb[33].mxu0  ;;  %v1325_v35 = vpop.f32.mrb[33].mxu1 }
 0x16a   :  { %1596 = vst.msk [vmem:[%s3323_s2 + $0x108] sm:$0xff] %vm1563_vm0, %v1005_v34  ;;  %1724 = vst.msk [vmem:[%s3323_s2 + $0x508] sm:$0xff] %vm1563_vm0, %v1325_v35  ;;  %v1007_v36 = vpop.f32.mrb[34].mxu0  ;;  %v1327_v37 = vpop.f32.mrb[34].mxu1 }
 0x16b   :  { %1597 = vst [vmem:[%s3323_s2 + $0x110] sm:$0xff] %v1007_v36  ;;  %1725 = vst [vmem:[%s3323_s2 + $0x510] sm:$0xff] %v1327_v37  ;;  %v1009_v38 = vpop.f32.mrb[35].mxu0  ;;  %v1329_v39 = vpop.f32.mrb[35].mxu1 }
 0x16c   :  { %1598 = vst.msk [vmem:[%s3323_s2 + $0x118] sm:$0xff] %vm1563_vm0, %v1009_v38  ;;  %1726 = vst.msk [vmem:[%s3323_s2 + $0x518] sm:$0xff] %vm1563_vm0, %v1329_v39 }
 0x170   :  { %v1013_v40 = vpop.f32.mrb[36].mxu0  ;;  %v1333_v41 = vpop.f32.mrb[36].mxu1 }
 0x171   :  { %1599 = vst [vmem:[%s3323_s2 + $0x120] sm:$0xff] %v1013_v40  ;;  %1727 = vst [vmem:[%s3323_s2 + $0x520] sm:$0xff] %v1333_v41  ;;  %v1015_v42 = vpop.f32.mrb[37].mxu0  ;;  %v1335_v43 = vpop.f32.mrb[37].mxu1 }
 0x172   :  { %1600 = vst.msk [vmem:[%s3323_s2 + $0x128] sm:$0xff] %vm1563_vm0, %v1015_v42  ;;  %1728 = vst.msk [vmem:[%s3323_s2 + $0x528] sm:$0xff] %vm1563_vm0, %v1335_v43  ;;  %v1017_v44 = vpop.f32.mrb[38].mxu0  ;;  %v1337_v45 = vpop.f32.mrb[38].mxu1 }
 0x173   :  { %1601 = vst [vmem:[%s3323_s2 + $0x130] sm:$0xff] %v1017_v44  ;;  %1729 = vst [vmem:[%s3323_s2 + $0x530] sm:$0xff] %v1337_v45  ;;  %v1019_v46 = vpop.f32.mrb[39].mxu0  ;;  %v1339_v47 = vpop.f32.mrb[39].mxu1 }
 0x174   :  { %1602 = vst.msk [vmem:[%s3323_s2 + $0x138] sm:$0xff] %vm1563_vm0, %v1019_v46  ;;  %1730 = vst.msk [vmem:[%s3323_s2 + $0x538] sm:$0xff] %vm1563_vm0, %v1339_v47 }
 0x178   :  { %v1023_v48 = vpop.f32.mrb[40].mxu0  ;;  %v1343_v49 = vpop.f32.mrb[40].mxu1 }
 0x179   :  { %1603 = vst [vmem:[%s3323_s2 + $0x140] sm:$0xff] %v1023_v48  ;;  %1731 = vst [vmem:[%s3323_s2 + $0x540] sm:$0xff] %v1343_v49  ;;  %v1025_v50 = vpop.f32.mrb[41].mxu0  ;;  %v1345_v51 = vpop.f32.mrb[41].mxu1 }
 0x17a   :  { %1604 = vst.msk [vmem:[%s3323_s2 + $0x148] sm:$0xff] %vm1563_vm0, %v1025_v50  ;;  %1732 = vst.msk [vmem:[%s3323_s2 + $0x548] sm:$0xff] %vm1563_vm0, %v1345_v51  ;;  %v1027_v52 = vpop.f32.mrb[42].mxu0  ;;  %v1347_v53 = vpop.f32.mrb[42].mxu1 }
 0x17b   :  { %1605 = vst [vmem:[%s3323_s2 + $0x150] sm:$0xff] %v1027_v52  ;;  %1733 = vst [vmem:[%s3323_s2 + $0x550] sm:$0xff] %v1347_v53  ;;  %v1029_v54 = vpop.f32.mrb[43].mxu0  ;;  %v1349_v55 = vpop.f32.mrb[43].mxu1 }
 0x17c   :  { %1606 = vst.msk [vmem:[%s3323_s2 + $0x158] sm:$0xff] %vm1563_vm0, %v1029_v54  ;;  %1734 = vst.msk [vmem:[%s3323_s2 + $0x558] sm:$0xff] %vm1563_vm0, %v1349_v55 }
 0x180   :  { %v1033_v56 = vpop.f32.mrb[44].mxu0  ;;  %v1353_v57 = vpop.f32.mrb[44].mxu1 }
 0x181   :  { %1607 = vst [vmem:[%s3323_s2 + $0x160] sm:$0xff] %v1033_v56  ;;  %1735 = vst [vmem:[%s3323_s2 + $0x560] sm:$0xff] %v1353_v57  ;;  %v1035_v58 = vpop.f32.mrb[45].mxu0  ;;  %v1355_v59 = vpop.f32.mrb[45].mxu1 }
 0x182   :  { %1608 = vst.msk [vmem:[%s3323_s2 + $0x168] sm:$0xff] %vm1563_vm0, %v1035_v58  ;;  %1736 = vst.msk [vmem:[%s3323_s2 + $0x568] sm:$0xff] %vm1563_vm0, %v1355_v59  ;;  %v1037_v60 = vpop.f32.mrb[46].mxu0  ;;  %v1357_v61 = vpop.f32.mrb[46].mxu1 }
 0x183   :  { %1609 = vst [vmem:[%s3323_s2 + $0x170] sm:$0xff] %v1037_v60  ;;  %1737 = vst [vmem:[%s3323_s2 + $0x570] sm:$0xff] %v1357_v61  ;;  %v1039_v62 = vpop.f32.mrb[47].mxu0  ;;  %v1359_v63 = vpop.f32.mrb[47].mxu1 }
 0x184   :  { %1610 = vst.msk [vmem:[%s3323_s2 + $0x178] sm:$0xff] %vm1563_vm0, %v1039_v62  ;;  %1738 = vst.msk [vmem:[%s3323_s2 + $0x578] sm:$0xff] %vm1563_vm0, %v1359_v63 }
 0x188   :  { %v1043_v0 = vpop.f32.mrb[48].mxu0  ;;  %v1363_v1 = vpop.f32.mrb[48].mxu1 }
 0x189   :  { %1611 = vst [vmem:[%s3323_s2 + $0x180] sm:$0xff] %v1043_v0  ;;  %1739 = vst [vmem:[%s3323_s2 + $0x580] sm:$0xff] %v1363_v1  ;;  %v1045_v2 = vpop.f32.mrb[49].mxu0  ;;  %v1365_v3 = vpop.f32.mrb[49].mxu1 }
 0x18a   :  { %1612 = vst.msk [vmem:[%s3323_s2 + $0x188] sm:$0xff] %vm1563_vm0, %v1045_v2  ;;  %1740 = vst.msk [vmem:[%s3323_s2 + $0x588] sm:$0xff] %vm1563_vm0, %v1365_v3  ;;  %v1047_v4 = vpop.f32.mrb[50].mxu0  ;;  %v1367_v5 = vpop.f32.mrb[50].mxu1 }
 0x18b   :  { %1613 = vst [vmem:[%s3323_s2 + $0x190] sm:$0xff] %v1047_v4  ;;  %1741 = vst [vmem:[%s3323_s2 + $0x590] sm:$0xff] %v1367_v5  ;;  %v1049_v6 = vpop.f32.mrb[51].mxu0  ;;  %v1369_v7 = vpop.f32.mrb[51].mxu1 }
 0x18c   :  { %1614 = vst.msk [vmem:[%s3323_s2 + $0x198] sm:$0xff] %vm1563_vm0, %v1049_v6  ;;  %1742 = vst.msk [vmem:[%s3323_s2 + $0x598] sm:$0xff] %vm1563_vm0, %v1369_v7 }
 0x190   :  { %v1053_v8 = vpop.f32.mrb[52].mxu0  ;;  %v1373_v9 = vpop.f32.mrb[52].mxu1 }
 0x191   :  { %1615 = vst [vmem:[%s3323_s2 + $0x1a0] sm:$0xff] %v1053_v8  ;;  %1743 = vst [vmem:[%s3323_s2 + $0x5a0] sm:$0xff] %v1373_v9  ;;  %v1055_v10 = vpop.f32.mrb[53].mxu0  ;;  %v1375_v11 = vpop.f32.mrb[53].mxu1 }
 0x192   :  { %1616 = vst.msk [vmem:[%s3323_s2 + $0x1a8] sm:$0xff] %vm1563_vm0, %v1055_v10  ;;  %1744 = vst.msk [vmem:[%s3323_s2 + $0x5a8] sm:$0xff] %vm1563_vm0, %v1375_v11  ;;  %v1057_v12 = vpop.f32.mrb[54].mxu0  ;;  %v1377_v13 = vpop.f32.mrb[54].mxu1 }
 0x193   :  { %1617 = vst [vmem:[%s3323_s2 + $0x1b0] sm:$0xff] %v1057_v12  ;;  %1745 = vst [vmem:[%s3323_s2 + $0x5b0] sm:$0xff] %v1377_v13  ;;  %v1059_v14 = vpop.f32.mrb[55].mxu0  ;;  %v1379_v15 = vpop.f32.mrb[55].mxu1 }
 0x194   :  { %1618 = vst.msk [vmem:[%s3323_s2 + $0x1b8] sm:$0xff] %vm1563_vm0, %v1059_v14  ;;  %1746 = vst.msk [vmem:[%s3323_s2 + $0x5b8] sm:$0xff] %vm1563_vm0, %v1379_v15 }
 0x198   :  { %v1063_v16 = vpop.f32.mrb[56].mxu0  ;;  %v1383_v17 = vpop.f32.mrb[56].mxu1 }
 0x199   :  { %1619 = vst [vmem:[%s3323_s2 + $0x1c0] sm:$0xff] %v1063_v16  ;;  %1747 = vst [vmem:[%s3323_s2 + $0x5c0] sm:$0xff] %v1383_v17  ;;  %v1065_v18 = vpop.f32.mrb[57].mxu0  ;;  %v1385_v19 = vpop.f32.mrb[57].mxu1 }
 0x19a   :  { %1620 = vst.msk [vmem:[%s3323_s2 + $0x1c8] sm:$0xff] %vm1563_vm0, %v1065_v18  ;;  %1748 = vst.msk [vmem:[%s3323_s2 + $0x5c8] sm:$0xff] %vm1563_vm0, %v1385_v19  ;;  %v1067_v20 = vpop.f32.mrb[58].mxu0  ;;  %v1387_v21 = vpop.f32.mrb[58].mxu1 }
 0x19b   :  { %1621 = vst [vmem:[%s3323_s2 + $0x1d0] sm:$0xff] %v1067_v20  ;;  %1749 = vst [vmem:[%s3323_s2 + $0x5d0] sm:$0xff] %v1387_v21  ;;  %v1069_v22 = vpop.f32.mrb[59].mxu0  ;;  %v1389_v23 = vpop.f32.mrb[59].mxu1 }
 0x19c   :  { %1622 = vst.msk [vmem:[%s3323_s2 + $0x1d8] sm:$0xff] %vm1563_vm0, %v1069_v22  ;;  %1750 = vst.msk [vmem:[%s3323_s2 + $0x5d8] sm:$0xff] %vm1563_vm0, %v1389_v23 }
 0x1a0   :  { %v1073_v24 = vpop.f32.mrb[60].mxu0  ;;  %v1393_v25 = vpop.f32.mrb[60].mxu1 }
 0x1a1   :  { %1623 = vst [vmem:[%s3323_s2 + $0x1e0] sm:$0xff] %v1073_v24  ;;  %1751 = vst [vmem:[%s3323_s2 + $0x5e0] sm:$0xff] %v1393_v25  ;;  %v1075_v26 = vpop.f32.mrb[61].mxu0  ;;  %v1395_v27 = vpop.f32.mrb[61].mxu1 }
 0x1a2   :  { %1624 = vst.msk [vmem:[%s3323_s2 + $0x1e8] sm:$0xff] %vm1563_vm0, %v1075_v26  ;;  %1752 = vst.msk [vmem:[%s3323_s2 + $0x5e8] sm:$0xff] %vm1563_vm0, %v1395_v27  ;;  %v1077_v28 = vpop.f32.mrb[62].mxu0  ;;  %v1397_v29 = vpop.f32.mrb[62].mxu1 }
 0x1a3   :  { %1625 = vst [vmem:[%s3323_s2 + $0x1f0] sm:$0xff] %v1077_v28  ;;  %1753 = vst [vmem:[%s3323_s2 + $0x5f0] sm:$0xff] %v1397_v29  ;;  %v1079_v30 = vpop.f32.mrb[63].mxu0  ;;  %v1399_v31 = vpop.f32.mrb[63].mxu1 }
 0x1a4   :  { %1626 = vst.msk [vmem:[%s3323_s2 + $0x1f8] sm:$0xff] %vm1563_vm0, %v1079_v30  ;;  %1754 = vst.msk [vmem:[%s3323_s2 + $0x5f8] sm:$0xff] %vm1563_vm0, %v1399_v31 }
 0x1a8   :  { %v1083_v32 = vpop.f32.mrb[64].mxu0  ;;  %v1403_v33 = vpop.f32.mrb[64].mxu1 }
 0x1a9   :  { %1627 = vst [vmem:[%s3323_s2 + $0x200] sm:$0xff] %v1083_v32  ;;  %1755 = vst [vmem:[%s3323_s2 + $0x600] sm:$0xff] %v1403_v33  ;;  %v1085_v34 = vpop.f32.mrb[65].mxu0  ;;  %v1405_v35 = vpop.f32.mrb[65].mxu1 }
 0x1aa   :  { %1628 = vst.msk [vmem:[%s3323_s2 + $0x208] sm:$0xff] %vm1563_vm0, %v1085_v34  ;;  %1756 = vst.msk [vmem:[%s3323_s2 + $0x608] sm:$0xff] %vm1563_vm0, %v1405_v35  ;;  %v1087_v36 = vpop.f32.mrb[66].mxu0  ;;  %v1407_v37 = vpop.f32.mrb[66].mxu1 }
 0x1ab   :  { %1629 = vst [vmem:[%s3323_s2 + $0x210] sm:$0xff] %v1087_v36  ;;  %1757 = vst [vmem:[%s3323_s2 + $0x610] sm:$0xff] %v1407_v37  ;;  %v1089_v38 = vpop.f32.mrb[67].mxu0  ;;  %v1409_v39 = vpop.f32.mrb[67].mxu1 }
 0x1ac   :  { %1630 = vst.msk [vmem:[%s3323_s2 + $0x218] sm:$0xff] %vm1563_vm0, %v1089_v38  ;;  %1758 = vst.msk [vmem:[%s3323_s2 + $0x618] sm:$0xff] %vm1563_vm0, %v1409_v39 }
 0x1b0   :  { %v1093_v40 = vpop.f32.mrb[68].mxu0  ;;  %v1413_v41 = vpop.f32.mrb[68].mxu1 }
 0x1b1   :  { %1631 = vst [vmem:[%s3323_s2 + $0x220] sm:$0xff] %v1093_v40  ;;  %1759 = vst [vmem:[%s3323_s2 + $0x620] sm:$0xff] %v1413_v41  ;;  %v1095_v42 = vpop.f32.mrb[69].mxu0  ;;  %v1415_v43 = vpop.f32.mrb[69].mxu1 }
 0x1b2   :  { %1632 = vst.msk [vmem:[%s3323_s2 + $0x228] sm:$0xff] %vm1563_vm0, %v1095_v42  ;;  %1760 = vst.msk [vmem:[%s3323_s2 + $0x628] sm:$0xff] %vm1563_vm0, %v1415_v43  ;;  %v1097_v44 = vpop.f32.mrb[70].mxu0  ;;  %v1417_v45 = vpop.f32.mrb[70].mxu1 }
 0x1b3   :  { %1633 = vst [vmem:[%s3323_s2 + $0x230] sm:$0xff] %v1097_v44  ;;  %1761 = vst [vmem:[%s3323_s2 + $0x630] sm:$0xff] %v1417_v45  ;;  %v1099_v46 = vpop.f32.mrb[71].mxu0  ;;  %v1419_v47 = vpop.f32.mrb[71].mxu1 }
 0x1b4   :  { %1634 = vst.msk [vmem:[%s3323_s2 + $0x238] sm:$0xff] %vm1563_vm0, %v1099_v46  ;;  %1762 = vst.msk [vmem:[%s3323_s2 + $0x638] sm:$0xff] %vm1563_vm0, %v1419_v47 }
 0x1b8   :  { %v1103_v48 = vpop.f32.mrb[72].mxu0  ;;  %v1423_v49 = vpop.f32.mrb[72].mxu1 }
 0x1b9   :  { %1635 = vst [vmem:[%s3323_s2 + $0x240] sm:$0xff] %v1103_v48  ;;  %1763 = vst [vmem:[%s3323_s2 + $0x640] sm:$0xff] %v1423_v49  ;;  %v1105_v50 = vpop.f32.mrb[73].mxu0  ;;  %v1425_v51 = vpop.f32.mrb[73].mxu1 }
 0x1ba   :  { %1636 = vst.msk [vmem:[%s3323_s2 + $0x248] sm:$0xff] %vm1563_vm0, %v1105_v50  ;;  %1764 = vst.msk [vmem:[%s3323_s2 + $0x648] sm:$0xff] %vm1563_vm0, %v1425_v51  ;;  %v1107_v52 = vpop.f32.mrb[74].mxu0  ;;  %v1427_v53 = vpop.f32.mrb[74].mxu1 }
 0x1bb   :  { %1637 = vst [vmem:[%s3323_s2 + $0x250] sm:$0xff] %v1107_v52  ;;  %1765 = vst [vmem:[%s3323_s2 + $0x650] sm:$0xff] %v1427_v53  ;;  %v1109_v54 = vpop.f32.mrb[75].mxu0  ;;  %v1429_v55 = vpop.f32.mrb[75].mxu1 }
 0x1bc   :  { %1638 = vst.msk [vmem:[%s3323_s2 + $0x258] sm:$0xff] %vm1563_vm0, %v1109_v54  ;;  %1766 = vst.msk [vmem:[%s3323_s2 + $0x658] sm:$0xff] %vm1563_vm0, %v1429_v55 }
 0x1c0   :  { %v1113_v56 = vpop.f32.mrb[76].mxu0  ;;  %v1433_v57 = vpop.f32.mrb[76].mxu1 }
 0x1c1   :  { %1639 = vst [vmem:[%s3323_s2 + $0x260] sm:$0xff] %v1113_v56  ;;  %1767 = vst [vmem:[%s3323_s2 + $0x660] sm:$0xff] %v1433_v57  ;;  %v1115_v58 = vpop.f32.mrb[77].mxu0  ;;  %v1435_v59 = vpop.f32.mrb[77].mxu1 }
 0x1c2   :  { %1640 = vst.msk [vmem:[%s3323_s2 + $0x268] sm:$0xff] %vm1563_vm0, %v1115_v58  ;;  %1768 = vst.msk [vmem:[%s3323_s2 + $0x668] sm:$0xff] %vm1563_vm0, %v1435_v59  ;;  %v1117_v60 = vpop.f32.mrb[78].mxu0  ;;  %v1437_v61 = vpop.f32.mrb[78].mxu1 }
 0x1c3   :  { %1641 = vst [vmem:[%s3323_s2 + $0x270] sm:$0xff] %v1117_v60  ;;  %1769 = vst [vmem:[%s3323_s2 + $0x670] sm:$0xff] %v1437_v61  ;;  %v1119_v62 = vpop.f32.mrb[79].mxu0  ;;  %v1439_v63 = vpop.f32.mrb[79].mxu1 }
 0x1c4   :  { %1642 = vst.msk [vmem:[%s3323_s2 + $0x278] sm:$0xff] %vm1563_vm0, %v1119_v62  ;;  %1770 = vst.msk [vmem:[%s3323_s2 + $0x678] sm:$0xff] %vm1563_vm0, %v1439_v63 }
 0x1c8   :  { %v1123_v0 = vpop.f32.mrb[80].mxu0  ;;  %v1443_v1 = vpop.f32.mrb[80].mxu1 }
 0x1c9   :  { %1643 = vst [vmem:[%s3323_s2 + $0x280] sm:$0xff] %v1123_v0  ;;  %1771 = vst [vmem:[%s3323_s2 + $0x680] sm:$0xff] %v1443_v1  ;;  %v1125_v2 = vpop.f32.mrb[81].mxu0  ;;  %v1445_v3 = vpop.f32.mrb[81].mxu1 }
 0x1ca   :  { %1644 = vst.msk [vmem:[%s3323_s2 + $0x288] sm:$0xff] %vm1563_vm0, %v1125_v2  ;;  %1772 = vst.msk [vmem:[%s3323_s2 + $0x688] sm:$0xff] %vm1563_vm0, %v1445_v3  ;;  %v1127_v4 = vpop.f32.mrb[82].mxu0  ;;  %v1447_v5 = vpop.f32.mrb[82].mxu1 }
 0x1cb   :  { %1645 = vst [vmem:[%s3323_s2 + $0x290] sm:$0xff] %v1127_v4  ;;  %1773 = vst [vmem:[%s3323_s2 + $0x690] sm:$0xff] %v1447_v5  ;;  %v1129_v6 = vpop.f32.mrb[83].mxu0  ;;  %v1449_v7 = vpop.f32.mrb[83].mxu1 }
 0x1cc   :  { %1646 = vst.msk [vmem:[%s3323_s2 + $0x298] sm:$0xff] %vm1563_vm0, %v1129_v6  ;;  %1774 = vst.msk [vmem:[%s3323_s2 + $0x698] sm:$0xff] %vm1563_vm0, %v1449_v7 }
 0x1d0   :  { %v1133_v8 = vpop.f32.mrb[84].mxu0  ;;  %v1453_v9 = vpop.f32.mrb[84].mxu1 }
 0x1d1   :  { %1647 = vst [vmem:[%s3323_s2 + $0x2a0] sm:$0xff] %v1133_v8  ;;  %1775 = vst [vmem:[%s3323_s2 + $0x6a0] sm:$0xff] %v1453_v9  ;;  %v1135_v10 = vpop.f32.mrb[85].mxu0  ;;  %v1455_v11 = vpop.f32.mrb[85].mxu1 }
 0x1d2   :  { %1648 = vst.msk [vmem:[%s3323_s2 + $0x2a8] sm:$0xff] %vm1563_vm0, %v1135_v10  ;;  %1776 = vst.msk [vmem:[%s3323_s2 + $0x6a8] sm:$0xff] %vm1563_vm0, %v1455_v11  ;;  %v1137_v12 = vpop.f32.mrb[86].mxu0  ;;  %v1457_v13 = vpop.f32.mrb[86].mxu1 }
 0x1d3   :  { %1649 = vst [vmem:[%s3323_s2 + $0x2b0] sm:$0xff] %v1137_v12  ;;  %1777 = vst [vmem:[%s3323_s2 + $0x6b0] sm:$0xff] %v1457_v13  ;;  %v1139_v14 = vpop.f32.mrb[87].mxu0  ;;  %v1459_v15 = vpop.f32.mrb[87].mxu1 }
 0x1d4   :  { %1650 = vst.msk [vmem:[%s3323_s2 + $0x2b8] sm:$0xff] %vm1563_vm0, %v1139_v14  ;;  %1778 = vst.msk [vmem:[%s3323_s2 + $0x6b8] sm:$0xff] %vm1563_vm0, %v1459_v15 }
 0x1d8   :  { %v1143_v16 = vpop.f32.mrb[88].mxu0  ;;  %v1463_v17 = vpop.f32.mrb[88].mxu1 }
 0x1d9   :  { %1651 = vst [vmem:[%s3323_s2 + $0x2c0] sm:$0xff] %v1143_v16  ;;  %1779 = vst [vmem:[%s3323_s2 + $0x6c0] sm:$0xff] %v1463_v17  ;;  %v1145_v18 = vpop.f32.mrb[89].mxu0  ;;  %v1465_v19 = vpop.f32.mrb[89].mxu1 }
 0x1da   :  { %1652 = vst.msk [vmem:[%s3323_s2 + $0x2c8] sm:$0xff] %vm1563_vm0, %v1145_v18  ;;  %1780 = vst.msk [vmem:[%s3323_s2 + $0x6c8] sm:$0xff] %vm1563_vm0, %v1465_v19  ;;  %v1147_v20 = vpop.f32.mrb[90].mxu0  ;;  %v1467_v21 = vpop.f32.mrb[90].mxu1 }
 0x1db   :  { %1653 = vst [vmem:[%s3323_s2 + $0x2d0] sm:$0xff] %v1147_v20  ;;  %1781 = vst [vmem:[%s3323_s2 + $0x6d0] sm:$0xff] %v1467_v21  ;;  %v1149_v22 = vpop.f32.mrb[91].mxu0  ;;  %v1469_v23 = vpop.f32.mrb[91].mxu1 }
 0x1dc   :  { %1654 = vst.msk [vmem:[%s3323_s2 + $0x2d8] sm:$0xff] %vm1563_vm0, %v1149_v22  ;;  %1782 = vst.msk [vmem:[%s3323_s2 + $0x6d8] sm:$0xff] %vm1563_vm0, %v1469_v23 }
 0x1e0   :  { %v1153_v24 = vpop.f32.mrb[92].mxu0  ;;  %v1473_v25 = vpop.f32.mrb[92].mxu1 }
 0x1e1   :  { %1655 = vst [vmem:[%s3323_s2 + $0x2e0] sm:$0xff] %v1153_v24  ;;  %1783 = vst [vmem:[%s3323_s2 + $0x6e0] sm:$0xff] %v1473_v25  ;;  %v1155_v26 = vpop.f32.mrb[93].mxu0  ;;  %v1475_v27 = vpop.f32.mrb[93].mxu1 }
 0x1e2   :  { %1656 = vst.msk [vmem:[%s3323_s2 + $0x2e8] sm:$0xff] %vm1563_vm0, %v1155_v26  ;;  %1784 = vst.msk [vmem:[%s3323_s2 + $0x6e8] sm:$0xff] %vm1563_vm0, %v1475_v27  ;;  %v1157_v28 = vpop.f32.mrb[94].mxu0  ;;  %v1477_v29 = vpop.f32.mrb[94].mxu1 }
 0x1e3   :  { %1657 = vst [vmem:[%s3323_s2 + $0x2f0] sm:$0xff] %v1157_v28  ;;  %1785 = vst [vmem:[%s3323_s2 + $0x6f0] sm:$0xff] %v1477_v29  ;;  %v1159_v30 = vpop.f32.mrb[95].mxu0  ;;  %v1479_v31 = vpop.f32.mrb[95].mxu1 }
 0x1e4   :  { %1658 = vst.msk [vmem:[%s3323_s2 + $0x2f8] sm:$0xff] %vm1563_vm0, %v1159_v30  ;;  %1786 = vst.msk [vmem:[%s3323_s2 + $0x6f8] sm:$0xff] %vm1563_vm0, %v1479_v31 }
 0x1e8   :  { %v1163_v32 = vpop.f32.mrb[96].mxu0  ;;  %v1483_v33 = vpop.f32.mrb[96].mxu1 }
 0x1e9   :  { %1659 = vst [vmem:[%s3323_s2 + $0x300] sm:$0xff] %v1163_v32  ;;  %1787 = vst [vmem:[%s3323_s2 + $0x700] sm:$0xff] %v1483_v33  ;;  %v1165_v34 = vpop.f32.mrb[97].mxu0  ;;  %v1485_v35 = vpop.f32.mrb[97].mxu1 }
 0x1ea   :  { %1660 = vst.msk [vmem:[%s3323_s2 + $0x308] sm:$0xff] %vm1563_vm0, %v1165_v34  ;;  %1788 = vst.msk [vmem:[%s3323_s2 + $0x708] sm:$0xff] %vm1563_vm0, %v1485_v35  ;;  %v1167_v36 = vpop.f32.mrb[98].mxu0  ;;  %v1487_v37 = vpop.f32.mrb[98].mxu1 }
 0x1eb   :  { %1661 = vst [vmem:[%s3323_s2 + $0x310] sm:$0xff] %v1167_v36  ;;  %1789 = vst [vmem:[%s3323_s2 + $0x710] sm:$0xff] %v1487_v37  ;;  %v1169_v38 = vpop.f32.mrb[99].mxu0  ;;  %v1489_v39 = vpop.f32.mrb[99].mxu1 }
 0x1ec   :  { %1662 = vst.msk [vmem:[%s3323_s2 + $0x318] sm:$0xff] %vm1563_vm0, %v1169_v38  ;;  %1790 = vst.msk [vmem:[%s3323_s2 + $0x718] sm:$0xff] %vm1563_vm0, %v1489_v39 }
 0x1f0   :  { %v1173_v40 = vpop.f32.mrb[100].mxu0  ;;  %v1493_v41 = vpop.f32.mrb[100].mxu1 }
 0x1f1   :  { %1663 = vst [vmem:[%s3323_s2 + $0x320] sm:$0xff] %v1173_v40  ;;  %1791 = vst [vmem:[%s3323_s2 + $0x720] sm:$0xff] %v1493_v41  ;;  %v1175_v42 = vpop.f32.mrb[101].mxu0  ;;  %v1495_v43 = vpop.f32.mrb[101].mxu1 }
 0x1f2   :  { %1664 = vst.msk [vmem:[%s3323_s2 + $0x328] sm:$0xff] %vm1563_vm0, %v1175_v42  ;;  %1792 = vst.msk [vmem:[%s3323_s2 + $0x728] sm:$0xff] %vm1563_vm0, %v1495_v43  ;;  %v1177_v44 = vpop.f32.mrb[102].mxu0  ;;  %v1497_v45 = vpop.f32.mrb[102].mxu1 }
 0x1f3   :  { %1665 = vst [vmem:[%s3323_s2 + $0x330] sm:$0xff] %v1177_v44  ;;  %1793 = vst [vmem:[%s3323_s2 + $0x730] sm:$0xff] %v1497_v45  ;;  %v1179_v46 = vpop.f32.mrb[103].mxu0  ;;  %v1499_v47 = vpop.f32.mrb[103].mxu1 }
 0x1f4   :  { %1666 = vst.msk [vmem:[%s3323_s2 + $0x338] sm:$0xff] %vm1563_vm0, %v1179_v46  ;;  %1794 = vst.msk [vmem:[%s3323_s2 + $0x738] sm:$0xff] %vm1563_vm0, %v1499_v47 }
 0x1f8   :  { %v1183_v48 = vpop.f32.mrb[104].mxu0  ;;  %v1503_v49 = vpop.f32.mrb[104].mxu1 }
 0x1f9   :  { %1667 = vst [vmem:[%s3323_s2 + $0x340] sm:$0xff] %v1183_v48  ;;  %1795 = vst [vmem:[%s3323_s2 + $0x740] sm:$0xff] %v1503_v49  ;;  %v1185_v50 = vpop.f32.mrb[105].mxu0  ;;  %v1505_v51 = vpop.f32.mrb[105].mxu1 }
 0x1fa   :  { %1668 = vst.msk [vmem:[%s3323_s2 + $0x348] sm:$0xff] %vm1563_vm0, %v1185_v50  ;;  %1796 = vst.msk [vmem:[%s3323_s2 + $0x748] sm:$0xff] %vm1563_vm0, %v1505_v51  ;;  %v1187_v52 = vpop.f32.mrb[106].mxu0  ;;  %v1507_v53 = vpop.f32.mrb[106].mxu1 }
 0x1fb   :  { %1669 = vst [vmem:[%s3323_s2 + $0x350] sm:$0xff] %v1187_v52  ;;  %1797 = vst [vmem:[%s3323_s2 + $0x750] sm:$0xff] %v1507_v53  ;;  %v1189_v54 = vpop.f32.mrb[107].mxu0  ;;  %v1509_v55 = vpop.f32.mrb[107].mxu1 }
 0x1fc   :  { %1670 = vst.msk [vmem:[%s3323_s2 + $0x358] sm:$0xff] %vm1563_vm0, %v1189_v54  ;;  %1798 = vst.msk [vmem:[%s3323_s2 + $0x758] sm:$0xff] %vm1563_vm0, %v1509_v55 }
 0x200   :  { %v1193_v56 = vpop.f32.mrb[108].mxu0  ;;  %v1513_v57 = vpop.f32.mrb[108].mxu1 }
 0x201   :  { %1671 = vst [vmem:[%s3323_s2 + $0x360] sm:$0xff] %v1193_v56  ;;  %1799 = vst [vmem:[%s3323_s2 + $0x760] sm:$0xff] %v1513_v57  ;;  %v1195_v58 = vpop.f32.mrb[109].mxu0  ;;  %v1515_v59 = vpop.f32.mrb[109].mxu1 }
 0x202   :  { %1672 = vst.msk [vmem:[%s3323_s2 + $0x368] sm:$0xff] %vm1563_vm0, %v1195_v58  ;;  %1800 = vst.msk [vmem:[%s3323_s2 + $0x768] sm:$0xff] %vm1563_vm0, %v1515_v59  ;;  %v1197_v60 = vpop.f32.mrb[110].mxu0  ;;  %v1517_v61 = vpop.f32.mrb[110].mxu1 }
 0x203   :  { %1673 = vst [vmem:[%s3323_s2 + $0x370] sm:$0xff] %v1197_v60  ;;  %1801 = vst [vmem:[%s3323_s2 + $0x770] sm:$0xff] %v1517_v61  ;;  %v1199_v62 = vpop.f32.mrb[111].mxu0  ;;  %v1519_v63 = vpop.f32.mrb[111].mxu1 }
 0x204   :  { %1674 = vst.msk [vmem:[%s3323_s2 + $0x378] sm:$0xff] %vm1563_vm0, %v1199_v62  ;;  %1802 = vst.msk [vmem:[%s3323_s2 + $0x778] sm:$0xff] %vm1563_vm0, %v1519_v63 }
 0x208   :  { %v1203_v0 = vpop.f32.mrb[112].mxu0  ;;  %v1523_v1 = vpop.f32.mrb[112].mxu1 }
 0x209   :  { %1675 = vst [vmem:[%s3323_s2 + $0x380] sm:$0xff] %v1203_v0  ;;  %1803 = vst [vmem:[%s3323_s2 + $0x780] sm:$0xff] %v1523_v1  ;;  %v1205_v2 = vpop.f32.mrb[113].mxu0  ;;  %v1525_v3 = vpop.f32.mrb[113].mxu1 }
 0x20a   :  { %1676 = vst.msk [vmem:[%s3323_s2 + $0x388] sm:$0xff] %vm1563_vm0, %v1205_v2  ;;  %1804 = vst.msk [vmem:[%s3323_s2 + $0x788] sm:$0xff] %vm1563_vm0, %v1525_v3  ;;  %v1207_v4 = vpop.f32.mrb[114].mxu0  ;;  %v1527_v5 = vpop.f32.mrb[114].mxu1 }
 0x20b   :  { %1677 = vst [vmem:[%s3323_s2 + $0x390] sm:$0xff] %v1207_v4  ;;  %1805 = vst [vmem:[%s3323_s2 + $0x790] sm:$0xff] %v1527_v5  ;;  %v1209_v6 = vpop.f32.mrb[115].mxu0  ;;  %v1529_v7 = vpop.f32.mrb[115].mxu1 }
 0x20c   :  { %1678 = vst.msk [vmem:[%s3323_s2 + $0x398] sm:$0xff] %vm1563_vm0, %v1209_v6  ;;  %1806 = vst.msk [vmem:[%s3323_s2 + $0x798] sm:$0xff] %vm1563_vm0, %v1529_v7 }
 0x210   :  { %v1213_v8 = vpop.f32.mrb[116].mxu0  ;;  %v1533_v9 = vpop.f32.mrb[116].mxu1 }
 0x211   :  { %1679 = vst [vmem:[%s3323_s2 + $0x3a0] sm:$0xff] %v1213_v8  ;;  %1807 = vst [vmem:[%s3323_s2 + $0x7a0] sm:$0xff] %v1533_v9  ;;  %v1215_v10 = vpop.f32.mrb[117].mxu0  ;;  %v1535_v11 = vpop.f32.mrb[117].mxu1 }
 0x212   :  { %1680 = vst.msk [vmem:[%s3323_s2 + $0x3a8] sm:$0xff] %vm1563_vm0, %v1215_v10  ;;  %1808 = vst.msk [vmem:[%s3323_s2 + $0x7a8] sm:$0xff] %vm1563_vm0, %v1535_v11  ;;  %v1217_v12 = vpop.f32.mrb[118].mxu0  ;;  %v1537_v13 = vpop.f32.mrb[118].mxu1 }
 0x213   :  { %1681 = vst [vmem:[%s3323_s2 + $0x3b0] sm:$0xff] %v1217_v12  ;;  %1809 = vst [vmem:[%s3323_s2 + $0x7b0] sm:$0xff] %v1537_v13  ;;  %v1219_v14 = vpop.f32.mrb[119].mxu0  ;;  %v1539_v15 = vpop.f32.mrb[119].mxu1 }
 0x214   :  { %1682 = vst.msk [vmem:[%s3323_s2 + $0x3b8] sm:$0xff] %vm1563_vm0, %v1219_v14  ;;  %1810 = vst.msk [vmem:[%s3323_s2 + $0x7b8] sm:$0xff] %vm1563_vm0, %v1539_v15 }
 0x218   :  { %v1223_v16 = vpop.f32.mrb[120].mxu0  ;;  %v1543_v17 = vpop.f32.mrb[120].mxu1 }
 0x219   :  { %1683 = vst [vmem:[%s3323_s2 + $0x3c0] sm:$0xff] %v1223_v16  ;;  %1811 = vst [vmem:[%s3323_s2 + $0x7c0] sm:$0xff] %v1543_v17  ;;  %v1225_v18 = vpop.f32.mrb[121].mxu0  ;;  %v1545_v19 = vpop.f32.mrb[121].mxu1 }
 0x21a   :  { %1684 = vst.msk [vmem:[%s3323_s2 + $0x3c8] sm:$0xff] %vm1563_vm0, %v1225_v18  ;;  %1812 = vst.msk [vmem:[%s3323_s2 + $0x7c8] sm:$0xff] %vm1563_vm0, %v1545_v19  ;;  %v1227_v20 = vpop.f32.mrb[122].mxu0  ;;  %v1547_v21 = vpop.f32.mrb[122].mxu1 }
 0x21b   :  { %1685 = vst [vmem:[%s3323_s2 + $0x3d0] sm:$0xff] %v1227_v20  ;;  %1813 = vst [vmem:[%s3323_s2 + $0x7d0] sm:$0xff] %v1547_v21  ;;  %v1229_v22 = vpop.f32.mrb[123].mxu0  ;;  %v1549_v23 = vpop.f32.mrb[123].mxu1 }
 0x21c   :  { %1686 = vst.msk [vmem:[%s3323_s2 + $0x3d8] sm:$0xff] %vm1563_vm0, %v1229_v22  ;;  %1814 = vst.msk [vmem:[%s3323_s2 + $0x7d8] sm:$0xff] %vm1563_vm0, %v1549_v23 }
 0x220   :  { %v1233_v24 = vpop.f32.mrb[124].mxu0  ;;  %v1553_v25 = vpop.f32.mrb[124].mxu1 }
 0x221   :  { %1687 = vst [vmem:[%s3323_s2 + $0x3e0] sm:$0xff] %v1233_v24  ;;  %1815 = vst [vmem:[%s3323_s2 + $0x7e0] sm:$0xff] %v1553_v25  ;;  %v1235_v26 = vpop.f32.mrb[125].mxu0  ;;  %v1555_v27 = vpop.f32.mrb[125].mxu1 }
 0x222   :  { %1688 = vst.msk [vmem:[%s3323_s2 + $0x3e8] sm:$0xff] %vm1563_vm0, %v1235_v26  ;;  %1816 = vst.msk [vmem:[%s3323_s2 + $0x7e8] sm:$0xff] %vm1563_vm0, %v1555_v27  ;;  %v1237_v28 = vpop.f32.mrb[126].mxu0  ;;  %v1557_v29 = vpop.f32.mrb[126].mxu1 }
 0x223   :  { %1689 = vst [vmem:[%s3323_s2 + $0x3f0] sm:$0xff] %v1237_v28  ;;  %1817 = vst [vmem:[%s3323_s2 + $0x7f0] sm:$0xff] %v1557_v29  ;;  %v1239_v30 = vpop.f32.mrb[127].mxu0  ;;  %v1559_v31 = vpop.f32.mrb[127].mxu1 }
 0x224   :  { %1690 = vst.msk [vmem:[%s3323_s2 + $0x3f8] sm:$0xff] %vm1563_vm0, %v1239_v30  ;;  %1818 = vst.msk [vmem:[%s3323_s2 + $0x7f8] sm:$0xff] %vm1563_vm0, %v1559_v31 }
 0x225   :  { %1823 = vsyncpa [#allocation3], 1 }

</bundles_post_ra>
